<compile_context>
chip_gen: v7x
topology: tpu7x:2x2x1
jax: 0.10.0
libtpu: 0.0.40
codegen_flags: <defaults>
</compile_context>

<pallas_src>
import functools
import math

import jax
import jax.numpy as jnp
from jax import lax
from jax.experimental import pallas as pl
from jax.experimental.pallas import tpu as pltpu

VMEM_SPEC = pl.BlockSpec(memory_space=pltpu.MemorySpace.VMEM)
SMEM_SPEC = pl.BlockSpec(memory_space=pltpu.MemorySpace.SMEM)

START_TAG = 0  # TODO(synk): original DecoderRNN uses tag_to_ix['<s>'] as the start tag.


# ------------------------------ Pallas kernels ------------------------------

def _char_cnn_kernel(x_ref, w_ref, b_ref, o_ref):
    """Char CNN block: fused k=3 conv (im2col'd input) + max-pool over chars.
    x: (NB, CL, 3*Dc)  w: (3*Dc, Co)  b: (1, Co)  o: (NB, Co)."""
    xb = x_ref[...].astype(jnp.bfloat16)
    wb = w_ref[...].astype(jnp.bfloat16)
    conv = jnp.einsum('ncd,do->nco', xb, wb, preferred_element_type=jnp.float32)
    # max(conv) + b == max(conv + b): bias is constant over the pooled axis.
    o_ref[...] = jnp.max(conv, axis=1) + b_ref[...]


def _bb_conv_kernel(x_ref, w_ref, b_ref, o_ref):
    """Bayesian word conv (k=3, pad=1 via im2col), all ELBO samples in one launch.
    x: (B*L, 3*Din) shared across samples; w: (S, 3*Din, Co); b: (S, 1, Co);
    o: (S, B*L, Co)."""
    S = w_ref.shape[0]
    xb = x_ref[...].astype(jnp.bfloat16)
    for s in range(S):
        o_ref[s] = (jnp.dot(xb, w_ref[s].astype(jnp.bfloat16),
                            preferred_element_type=jnp.float32) + b_ref[s])


def _make_decoder_kernel(L, Bp):
    """Teacher-forced LSTM decoder + masked NLL; ELBO samples folded into batch Bp.
    xin: (L*Bp, Dx) time-major rows (row = t*Bp + b); tags/mask: (L*Bp, 1);
    wih: (4, Dx, H); whh: (4, H, H); b: (4, 1, H) (= b_ih + b_hh per gate);
    wout: (H, Tp) 128-lane padded; bout: (1, Tp) with -1e9 on padded tag columns.
    loss: (1,) scalar = SUM of masked NLL over all rows/timesteps."""

    def kernel(xin_ref, tags_ref, mask_ref, wih_ref, whh_ref, b_ref,
               wout_ref, bout_ref, loss_ref,
               gi_ref, gf_ref, gg_ref, go_ref, hall_ref):
        H = whh_ref.shape[2]

        # ---- hoisted input projection: one (L*Bp, Dx) @ (Dx, H) matmul per gate ----
        xb = xin_ref[...].astype(jnp.bfloat16)
        gate_scratch = (gi_ref, gf_ref, gg_ref, go_ref)
        for g in range(4):   # PyTorch LSTMCell gate order: i, f, g, o
            gate_scratch[g][...] = (
                jnp.dot(xb, wih_ref[g].astype(jnp.bfloat16),
                        preferred_element_type=jnp.float32) + b_ref[g])

        whh = [whh_ref[g].astype(jnp.bfloat16) for g in range(4)]  # loop-invariant

        def step(t, carry):
            h, c = carry
            hb = h.astype(jnp.bfloat16)
            r = pl.multiple_of(t * Bp, Bp)
            i_g = jax.nn.sigmoid(gi_ref[pl.ds(r, Bp), :] +
                                 jnp.dot(hb, whh[0], preferred_element_type=jnp.float32))
            f_g = jax.nn.sigmoid(gf_ref[pl.ds(r, Bp), :] +
                                 jnp.dot(hb, whh[1], preferred_element_type=jnp.float32))
            g_g = jnp.tanh(gg_ref[pl.ds(r, Bp), :] +
                           jnp.dot(hb, whh[2], preferred_element_type=jnp.float32))
            o_g = jax.nn.sigmoid(go_ref[pl.ds(r, Bp), :] +
                                 jnp.dot(hb, whh[3], preferred_element_type=jnp.float32))
            c_n = f_g * c + i_g * g_g
            h_n = o_g * jnp.tanh(c_n)
            hall_ref[pl.ds(r, Bp), :] = h_n
            return (h_n, c_n)

        h0 = jnp.zeros((Bp, H), jnp.float32)
        c0 = jnp.zeros((Bp, H), jnp.float32)
        _ = lax.fori_loop(0, L, step, (h0, c0))

        # ---- hoisted output projection + log-softmax + masked NLL (lane-dense Tp) ----
        hb_all = hall_ref[...].astype(jnp.bfloat16)
        scores = (jnp.dot(hb_all, wout_ref[...].astype(jnp.bfloat16),
                          preferred_element_type=jnp.float32) + bout_ref[...])
        m = jnp.max(scores, axis=-1, keepdims=True)
        logz = m + jnp.log(jnp.sum(jnp.exp(scores - m), axis=-1, keepdims=True))
        logp = scores - logz
        sel = (lax.broadcasted_iota(jnp.int32, scores.shape, 1)
               == tags_ref[...]).astype(jnp.float32)                 # replaces one-hot input
        nll = -jnp.sum(sel * logp, axis=-1, keepdims=True)           # (L*Bp, 1)
        loss_ref[0] = jnp.sum(nll * mask_ref[...])

    return kernel


# ------------------------------ model glue ------------------------------

def init_params(key, cfg):
    ks = jax.random.split(key, 12)

    def nrm(k, shape, scale=0.1):
        return (scale * jax.random.normal(k, shape)).astype(jnp.float32)

    Din = cfg['Dw'] + cfg['Co_char']
    H, T = cfg['H'], cfg['T']
    Daug = cfg['Co_word'] + Din
    Dx = Daug + H
    p = {
        'char_emb': nrm(ks[0], (cfg['char_vocab'], cfg['Dc'])),
        'char_w': nrm(ks[1], (cfg['Co_char'], cfg['Dc'], 3)),
        'char_b': nrm(ks[2], (cfg['Co_char'],), 0.01),
        'word_emb': nrm(ks[3], (cfg['word_vocab'], cfg['Dw'])),
        'bb_mu_w': nrm(ks[4], (cfg['Co_word'], Din, 3)),
        'bb_rho_w': jnp.full((cfg['Co_word'], Din, 3), -3.0, jnp.float32),
        'bb_mu_b': nrm(ks[5], (cfg['Co_word'],), 0.01),
        'bb_rho_b': jnp.full((cfg['Co_word'],), -3.0, jnp.float32),
        'tag_emb': nrm(ks[6], (T, H)),
        'w_ih': nrm(ks[7], (4 * H, Dx)),
        'w_hh': nrm(ks[8], (4 * H, H)),
        'b_ih': jnp.zeros((4 * H,), jnp.float32),
        'b_hh': jnp.zeros((4 * H,), jnp.float32),
        'w_out': nrm(ks[9], (T, H)),
        'b_out': jnp.zeros((T,), jnp.float32),
    }
    return p


def char_encoder(chars, params):
    """CharEncoderCNN: embed -> conv1d(k=3, pad=1) -> max over chars (single fused kernel)."""
    B, L, CL = chars.shape
    N = B * L
    Dc = params['char_emb'].shape[1]
    Co = params['char_w'].shape[0]

    emb = params['char_emb'][chars.reshape(N, CL)]                       # (N, CL, Dc)
    emb_pad = jnp.pad(emb, ((0, 0), (1, 1), (0, 0)))
    # im2col over the k=3 window: feature block k holds x[t + k - 1]
    xcol = jnp.concatenate([emb_pad[:, k:k + CL, :] for k in range(3)], axis=-1)  # (N, CL, 3*Dc)
    w2d = jnp.transpose(params['char_w'], (2, 1, 0)).reshape(3 * Dc, Co)          # tap-major rows
    b = params['char_b'][None, :]

    # Row grid over the word axis (megacore-parallel). At production B*L, raise the
    # block size toward a few hundred rows per step.
    GN = 8 if N % 8 == 0 else N
    out = pl.pallas_call(
        _char_cnn_kernel,
        out_shape=jax.ShapeDtypeStruct((N, Co), jnp.float32),
        grid=(N // GN,),
        in_specs=[pl.BlockSpec((GN, CL, 3 * Dc), lambda i: (i, 0, 0)),
                  pl.BlockSpec((3 * Dc, Co), lambda i: (0, 0)),
                  pl.BlockSpec((1, Co), lambda i: (0, 0))],
        out_specs=pl.BlockSpec((GN, Co), lambda i: (i, 0)),
        compiler_params=pltpu.CompilerParams(dimension_semantics=("parallel",)),
    )(xcol, w2d, b)
    # TODO(synk): charslen is ignored — max-pool runs over the full padded char width,
    # matching the reference CharEncoderCNN.
    return out.reshape(B, L, Co)


def word_conv_bb_batched(word_input_feats, w_samples, b_samples):
    """WordEncoderCNN_BB conv (k=3, pad=1), all ELBO samples in ONE kernel launch."""
    B, L, Din = word_input_feats.shape
    S, Co, _, K = w_samples.shape                                       # (S, Co, Din, 3)

    xpad = jnp.pad(word_input_feats, ((0, 0), (1, 1), (0, 0)))
    xcol = jnp.concatenate([xpad[:, k:k + L, :] for k in range(K)], axis=-1)  # (B, L, 3*Din)
    xcol = xcol.reshape(B * L, K * Din)
    w2d = jnp.transpose(w_samples, (0, 3, 2, 1)).reshape(S, K * Din, Co)      # tap-major rows

    out = pl.pallas_call(
        _bb_conv_kernel,
        out_shape=jax.ShapeDtypeStruct((S, B * L, Co), jnp.float32),
        in_specs=[VMEM_SPEC] * 3,
        out_specs=VMEM_SPEC,
    )(xcol, w2d, b_samples[:, None, :])
    return out.reshape(S, B, L, Co)


def gaussian_log_probs(w_s, b_s, mu_w, mu_b, sig_w, sig_b, sigma_prior, n_samples):
    """Mean over samples of sum log N(w;0,sigma_prior) and sum log N(w;mu,sig).
    Plain JAX per perf review: the ~5K-element reduction is cheaper than a kernel launch."""
    c = -0.5 * math.log(2.0 * math.pi)
    log_sp = math.log(sigma_prior)
    inv_2sp2 = 1.0 / (2.0 * sigma_prior * sigma_prior)

    def log_prior(x):
        return jnp.sum(c - log_sp - (x * x) * inv_2sp2)

    def log_post(x, mu, sig):
        return jnp.sum(c - jnp.log(sig) - ((x - mu) ** 2) / (2.0 * sig * sig))

    lpw = log_prior(w_s) + log_prior(b_s)
    lqw = (log_post(w_s, mu_w[None], sig_w[None]) +
           log_post(b_s, mu_b[None], sig_b[None]))
    return lpw / n_samples, lqw / n_samples


def decoder_loss_batched(word_feats_s, word_input_feats, tags, mask, params):
    """DecoderRNN over [features ; emb(prev gold tag)]; samples folded into the batch.
    Returns SUM over samples of the masked NLL (one kernel launch total)."""
    S, B, L, Cw = word_feats_s.shape
    Din = word_input_feats.shape[-1]
    H = params['w_hh'].shape[1]
    T = params['w_out'].shape[0]

    feats = jnp.concatenate(
        [word_feats_s,
         jnp.broadcast_to(word_input_feats[None], (S, B, L, Din))], axis=-1)  # (S,B,L,Daug)
    prev_tags = jnp.concatenate(
        [jnp.full((B, 1), START_TAG, tags.dtype), tags[:, :-1]], axis=1)
    ptag_emb = params['tag_emb'][prev_tags]                                   # (B, L, H)
    # TODO(synk): decoder input dropout (p=0.5) omitted — deterministic / eval semantics.
    xin = jnp.concatenate(
        [feats, jnp.broadcast_to(ptag_emb[None], (S, B, L, H))], axis=-1)     # (S,B,L,Dx)
    Dx = xin.shape[-1]

    SB = S * B
    Bp = max(8, -(-SB // 8) * 8)      # pad folded batch to full sublane tiles
    pad = Bp - SB
    xin = jnp.pad(xin.reshape(SB, L, Dx), ((0, pad), (0, 0), (0, 0)))
    tags_sb = jnp.pad(jnp.broadcast_to(tags[None], (S, B, L)).reshape(SB, L),
                      ((0, pad), (0, 0)))
    mask_sb = jnp.pad(jnp.broadcast_to(mask[None], (S, B, L)).reshape(SB, L),
                      ((0, pad), (0, 0)))

    # time-major flattening: row = t*Bp + (sample*B + b)
    xin2d = jnp.transpose(xin, (1, 0, 2)).reshape(L * Bp, Dx)
    tags2d = jnp.transpose(tags_sb, (1, 0)).reshape(L * Bp, 1).astype(jnp.int32)
    mask2d = jnp.transpose(mask_sb, (1, 0)).reshape(L * Bp, 1).astype(jnp.float32)

    # Gate-split weights (PyTorch LSTMCell layout: [i,f,g,o] stacked on dim 0) so the
    # kernel never lane-slices a packed 4H gate block.
    wih = params['w_ih'].reshape(4, H, Dx).transpose(0, 2, 1)                 # (4, Dx, H)
    whh = params['w_hh'].reshape(4, H, H).transpose(0, 2, 1)                  # (4, H, H)
    b = (params['b_ih'] + params['b_hh']).reshape(4, 1, H)

    # Lane-dense (128-padded) tag dimension; padded logits pushed to -1e9.
    Tp = -(-T // 128) * 128
    wout = jnp.zeros((H, Tp), jnp.float32).at[:, :T].set(params['w_out'].T)
    bout = jnp.full((1, Tp), -1e9, jnp.float32).at[0, :T].set(params['b_out'])

    loss = pl.pallas_call(
        _make_decoder_kernel(L, Bp),
        out_shape=jax.ShapeDtypeStruct((1,), jnp.float32),
        in_specs=[VMEM_SPEC] * 8,
        out_specs=SMEM_SPEC,
        scratch_shapes=[pltpu.VMEM((L * Bp, H), jnp.float32)] * 5,   # gi, gf, gg, go, h_all
    )(xin2d, tags2d, mask2d, wih, whh, b, wout, bout)
    return loss[0]


def bayes_loss_function(l_pw, l_qw, l_llh, n_batches, batch_size):
    # Standard Bayes-by-Backprop objective: scaled KL minus data log-likelihood.
    return ((1.0 / n_batches) * (l_qw - l_pw) - l_llh) / float(batch_size)


def model_forward(params, words, tags, chars, caps, wordslen, charslen,
                  tagsmask, n_batches, key, n_samples=3, sigma_prior=0.1):
    del caps, wordslen, charslen  # cap_embedding_dim == 0; lengths encoded via tagsmask
    B, L = words.shape

    # ---- sample-invariant features, computed once (hoisted out of the ELBO loop) ----
    char_feats = char_encoder(chars, params)                              # (B, L, Co_char)
    word_emb = params['word_emb'][words]                                  # (B, L, Dw)
    word_input_feats = jnp.concatenate([word_emb, char_feats], axis=2)    # (B, L, Din)
    # TODO(synk): word-encoder input dropout (p=0.5) omitted — eval semantics.

    # ---- all n_samples reparameterized weight draws at once ----
    kw, kb = jax.random.split(key)
    eps_w = jax.random.normal(kw, (n_samples,) + params['bb_mu_w'].shape, jnp.float32)
    eps_b = jax.random.normal(kb, (n_samples,) + params['bb_mu_b'].shape, jnp.float32)
    sig_w = jnp.log1p(jnp.exp(params['bb_rho_w']))                        # softplus(rho)
    sig_b = jnp.log1p(jnp.exp(params['bb_rho_b']))
    w_s = params['bb_mu_w'][None] + sig_w[None] * eps_w                   # (S, Co, Din, 3)
    b_s = params['bb_mu_b'][None] + sig_b[None] * eps_b                   # (S, Co)

    # ---- Bayesian word conv: all samples in one kernel launch ----
    word_feats_s = word_conv_bb_batched(word_input_feats, w_s, b_s)       # (S, B, L, Co_w)

    # ---- KL terms (mean over samples) ----
    log_pw, log_qw = gaussian_log_probs(
        w_s, b_s, params['bb_mu_w'], params['bb_mu_b'], sig_w, sig_b,
        sigma_prior, n_samples)

    # ---- decoder (samples folded into the batch); mean log-likelihood ----
    sum_loss = decoder_loss_batched(word_feats_s, word_input_feats, tags, tagsmask, params)
    log_llh = -sum_loss / n_samples
    return bayes_loss_function(log_pw, log_qw, log_llh, n_batches, B)


# ------------------------------ main ------------------------------

if __name__ == "__main__":
    cfg = dict(word_vocab=50, Dw=32, Co_word=32,
               char_vocab=20, Dc=16, Co_char=16,
               H=32, T=5)

    key = jax.random.PRNGKey(0)
    kp, kd = jax.random.split(key)
    params = init_params(kp, cfg)

    B, L, CL = 2, 8, 12
    kws = jax.random.split(kd, 6)
    words = jax.random.randint(kws[0], (B, L), 0, cfg['word_vocab'], jnp.int32)
    tags = jax.random.randint(kws[1], (B, L), 0, cfg['T'], jnp.int32)
    chars = jax.random.randint(kws[2], (B, L, CL), 0, cfg['char_vocab'], jnp.int32)
    caps = jax.random.randint(kws[3], (B, L), 0, 4, jnp.int32)
    wordslen = jnp.array([L, L - 2], jnp.int32)
    charslen = jnp.full((B, L), CL, jnp.int32)
    tagsmask = (jnp.arange(L)[None, :] < wordslen[:, None]).astype(jnp.float32)

    fwd = jax.jit(functools.partial(model_forward, n_samples=3, sigma_prior=0.1))
    loss = fwd(params, words, tags, chars, caps, wordslen, charslen,
               tagsmask, 10.0, kws[4])
    loss = jax.block_until_ready(loss)
    assert bool(jnp.isfinite(loss))
    print("KERNEL_OK")
</pallas_src>

<mosaic_0001>
module attributes {stable_mosaic.version = 11 : i64} {
  func.func @_char_cnn_kernel(%arg0: i32, %arg1: memref<8x12x48xf32, #tpu.memory_space<vmem>>, %arg2: memref<48x16xf32, #tpu.memory_space<vmem>>, %arg3: memref<1x16xf32, #tpu.memory_space<vmem>>, %arg4: memref<8x16xf32, #tpu.memory_space<vmem>>) attributes {dimension_semantics = [#tpu.dimension_semantics<parallel>], iteration_bounds = array<i64: 2>, scalar_prefetch = 0 : i64, scratch_operands = 0 : i64, tpu.core_type = #tpu.core_type<tc>, window_params = [{transform_indices = @transform_0, window_bounds = array<i64: 8, 12, 48>}, {pipeline_mode = #tpu.pipeline_mode<synchronous>, transform_indices = @transform_1, window_bounds = array<i64: 48, 16>}, {pipeline_mode = #tpu.pipeline_mode<synchronous>, transform_indices = @transform_2, window_bounds = array<i64: 1, 16>}, {transform_indices = @transform_3, window_bounds = array<i64: 8, 16>}]} {
    %c0 = arith.constant 0 : index
    %c0_0 = arith.constant 0 : index
    %c0_1 = arith.constant 0 : index
    %0 = vector.load %arg1[%c0, %c0_0, %c0_1] : memref<8x12x48xf32, #tpu.memory_space<vmem>>, vector<8x12x48xf32>
    %1 = arith.truncf %0 : vector<8x12x48xf32> to vector<8x12x48xbf16>
    %c0_2 = arith.constant 0 : index
    %c0_3 = arith.constant 0 : index
    %2 = vector.load %arg2[%c0_2, %c0_3] : memref<48x16xf32, #tpu.memory_space<vmem>>, vector<48x16xf32>
    %3 = arith.truncf %2 : vector<48x16xf32> to vector<48x16xbf16>
    "tpu.trace_start"() <{level = 10 : i32, message = "ncd,do->nco"}> : () -> ()
    %cst = arith.constant dense<0.000000e+00> : vector<8x12x16xf32>
    %4 = tpu.matmul %1, %3, %cst {dimension_numbers = #tpu.dot_dimension_numbers<[2], [0], [0, 1], [1], [0, 0, 0, 1, 1, 1], [], []>} : vector<8x12x48xbf16>, vector<48x16xbf16>, vector<8x12x16xf32> -> vector<8x12x16xf32>
    "tpu.trace_stop"() : () -> ()
    %cst_4 = arith.constant dense<0xFF800000> : vector<8x16xf32>
    %5 = vector.multi_reduction <maximumf>, %4, %cst_4 [1] : vector<8x12x16xf32> to vector<8x16xf32>
    %c0_5 = arith.constant 0 : index
    %c0_6 = arith.constant 0 : index
    %6 = vector.load %arg3[%c0_5, %c0_6] : memref<1x16xf32, #tpu.memory_space<vmem>>, vector<1x16xf32>
    %7 = vector.broadcast %6 : vector<1x16xf32> to vector<8x16xf32>
    %8 = arith.addf %5, %7 : vector<8x16xf32>
    %c0_7 = arith.constant 0 : index
    %c0_8 = arith.constant 0 : index
    %9 = vector.load %arg4[%c0_7, %c0_8] : memref<8x16xf32, #tpu.memory_space<vmem>>, vector<8x16xf32>
    tpu.vector_store %arg4[%c0_7, %c0_8], %8 {strides = array<i32>} : memref<8x16xf32, #tpu.memory_space<vmem>>, vector<8x16xf32>,
    return
  }
  func.func @transform_0(%arg0: i32) -> (i32, i32, i32) {
    %c0_i32 = arith.constant 0 : i32
    %c0_i32_0 = arith.constant 0 : i32
    %c0_i32_1 = arith.constant 0 : i32
    return %arg0, %c0_i32, %c0_i32_0 : i32, i32, i32
  }
  func.func @transform_1(%arg0: i32) -> (i32, i32) {
    %c0_i32 = arith.constant 0 : i32
    %c0_i32_0 = arith.constant 0 : i32
    %c0_i32_1 = arith.constant 0 : i32
    return %c0_i32, %c0_i32_0 : i32, i32
  }
  func.func @transform_2(%arg0: i32) -> (i32, i32) {
    %c0_i32 = arith.constant 0 : i32
    %c0_i32_0 = arith.constant 0 : i32
    %c0_i32_1 = arith.constant 0 : i32
    return %c0_i32, %c0_i32_0 : i32, i32
  }
  func.func @transform_3(%arg0: i32) -> (i32, i32) {
    %c0_i32 = arith.constant 0 : i32
    %c0_i32_0 = arith.constant 0 : i32
    return %arg0, %c0_i32 : i32, i32
  }
}

module attributes {stable_mosaic.version = 11 : i64} {
  func.func @_bb_conv_kernel(%arg0: memref<16x144xf32, #tpu.memory_space<vmem>>, %arg1: memref<3x144x32xf32, #tpu.memory_space<vmem>>, %arg2: memref<3x1x32xf32, #tpu.memory_space<vmem>>, %arg3: memref<3x16x32xf32, #tpu.memory_space<vmem>>) attributes {dimension_semantics = [], scalar_prefetch = 0 : i64, scratch_operands = 0 : i64, tpu.core_type = #tpu.core_type<tc>} {
    %c0 = arith.constant 0 : index
    %c0_0 = arith.constant 0 : index
    %0 = vector.load %arg0[%c0, %c0_0] : memref<16x144xf32, #tpu.memory_space<vmem>>, vector<16x144xf32>
    %1 = arith.truncf %0 : vector<16x144xf32> to vector<16x144xbf16>
    %c0_1 = arith.constant 0 : index
    %c0_2 = arith.constant 0 : index
    %c0_3 = arith.constant 0 : index
    %2 = vector.load %arg1[%c0_1, %c0_2, %c0_3] : memref<3x144x32xf32, #tpu.memory_space<vmem>>, vector<1x144x32xf32>
    %3 = vector.shape_cast %2 : vector<1x144x32xf32> to vector<144x32xf32>
    %4 = arith.truncf %3 : vector<144x32xf32> to vector<144x32xbf16>
    %cst = arith.constant dense<0.000000e+00> : vector<16x32xf32>
    %5 = tpu.matmul %1, %4, %cst {dimension_numbers = #tpu.dot_dimension_numbers<[1], [0], [0], [1], [0, 0, 1, 1], [], []>} : vector<16x144xbf16>, vector<144x32xbf16>, vector<16x32xf32> -> vector<16x32xf32>
    %c0_4 = arith.constant 0 : index
    %c0_5 = arith.constant 0 : index
    %c0_6 = arith.constant 0 : index
    %6 = vector.load %arg2[%c0_4, %c0_5, %c0_6] : memref<3x1x32xf32, #tpu.memory_space<vmem>>, vector<1x1x32xf32>
    %7 = vector.shape_cast %6 : vector<1x1x32xf32> to vector<1x32xf32>
    %8 = vector.broadcast %7 : vector<1x32xf32> to vector<16x32xf32>
    %9 = arith.addf %5, %8 : vector<16x32xf32>
    %c0_7 = arith.constant 0 : index
    %c0_8 = arith.constant 0 : index
    %c0_9 = arith.constant 0 : index
    %10 = vector.load %arg3[%c0_7, %c0_8, %c0_9] : memref<3x16x32xf32, #tpu.memory_space<vmem>>, vector<1x16x32xf32>
    %11 = vector.shape_cast %10 : vector<1x16x32xf32> to vector<16x32xf32>
    %12 = vector.shape_cast %9 : vector<16x32xf32> to vector<1x16x32xf32>
    tpu.vector_store %arg3[%c0_7, %c0_8, %c0_9], %12 {strides = array<i32>} : memref<3x16x32xf32, #tpu.memory_space<vmem>>, vector<1x16x32xf32>,
    %c1 = arith.constant 1 : index
    %c0_10 = arith.constant 0 : index
    %c0_11 = arith.constant 0 : index
    %13 = vector.load %arg1[%c1, %c0_10, %c0_11] : memref<3x144x32xf32, #tpu.memory_space<vmem>>, vector<1x144x32xf32>
    %14 = vector.shape_cast %13 : vector<1x144x32xf32> to vector<144x32xf32>
    %15 = arith.truncf %14 : vector<144x32xf32> to vector<144x32xbf16>
    %cst_12 = arith.constant dense<0.000000e+00> : vector<16x32xf32>
    %16 = tpu.matmul %1, %15, %cst_12 {dimension_numbers = #tpu.dot_dimension_numbers<[1], [0], [0], [1], [0, 0, 1, 1], [], []>} : vector<16x144xbf16>, vector<144x32xbf16>, vector<16x32xf32> -> vector<16x32xf32>
    %c1_13 = arith.constant 1 : index
    %c0_14 = arith.constant 0 : index
    %c0_15 = arith.constant 0 : index
    %17 = vector.load %arg2[%c1_13, %c0_14, %c0_15] : memref<3x1x32xf32, #tpu.memory_space<vmem>>, vector<1x1x32xf32>
    %18 = vector.shape_cast %17 : vector<1x1x32xf32> to vector<1x32xf32>
    %19 = vector.broadcast %18 : vector<1x32xf32> to vector<16x32xf32>
    %20 = arith.addf %16, %19 : vector<16x32xf32>
    %c1_16 = arith.constant 1 : index
    %c0_17 = arith.constant 0 : index
    %c0_18 = arith.constant 0 : index
    %21 = vector.load %arg3[%c1_16, %c0_17, %c0_18] : memref<3x16x32xf32, #tpu.memory_space<vmem>>, vector<1x16x32xf32>
    %22 = vector.shape_cast %21 : vector<1x16x32xf32> to vector<16x32xf32>
    %23 = vector.shape_cast %20 : vector<16x32xf32> to vector<1x16x32xf32>
    tpu.vector_store %arg3[%c1_16, %c0_17, %c0_18], %23 {strides = array<i32>} : memref<3x16x32xf32, #tpu.memory_space<vmem>>, vector<1x16x32xf32>,
    %c2 = arith.constant 2 : index
    %c0_19 = arith.constant 0 : index
    %c0_20 = arith.constant 0 : index
    %24 = vector.load %arg1[%c2, %c0_19, %c0_20] : memref<3x144x32xf32, #tpu.memory_space<vmem>>, vector<1x144x32xf32>
    %25 = vector.shape_cast %24 : vector<1x144x32xf32> to vector<144x32xf32>
    %26 = arith.truncf %25 : vector<144x32xf32> to vector<144x32xbf16>
    %cst_21 = arith.constant dense<0.000000e+00> : vector<16x32xf32>
    %27 = tpu.matmul %1, %26, %cst_21 {dimension_numbers = #tpu.dot_dimension_numbers<[1], [0], [0], [1], [0, 0, 1, 1], [], []>} : vector<16x144xbf16>, vector<144x32xbf16>, vector<16x32xf32> -> vector<16x32xf32>
    %c2_22 = arith.constant 2 : index
    %c0_23 = arith.constant 0 : index
    %c0_24 = arith.constant 0 : index
    %28 = vector.load %arg2[%c2_22, %c0_23, %c0_24] : memref<3x1x32xf32, #tpu.memory_space<vmem>>, vector<1x1x32xf32>
    %29 = vector.shape_cast %28 : vector<1x1x32xf32> to vector<1x32xf32>
    %30 = vector.broadcast %29 : vector<1x32xf32> to vector<16x32xf32>
    %31 = arith.addf %27, %30 : vector<16x32xf32>
    %c2_25 = arith.constant 2 : index
    %c0_26 = arith.constant 0 : index
    %c0_27 = arith.constant 0 : index
    %32 = vector.load %arg3[%c2_25, %c0_26, %c0_27] : memref<3x16x32xf32, #tpu.memory_space<vmem>>, vector<1x16x32xf32>
    %33 = vector.shape_cast %32 : vector<1x16x32xf32> to vector<16x32xf32>
    %34 = vector.shape_cast %31 : vector<16x32xf32> to vector<1x16x32xf32>
    tpu.vector_store %arg3[%c2_25, %c0_26, %c0_27], %34 {strides = array<i32>} : memref<3x16x32xf32, #tpu.memory_space<vmem>>, vector<1x16x32xf32>,
    return
  }
}

module attributes {stable_mosaic.version = 11 : i64} {
  func.func @kernel(%arg0: memref<64x112xf32, #tpu.memory_space<vmem>>, %arg1: memref<64x1xi32, #tpu.memory_space<vmem>>, %arg2: memref<64x1xf32, #tpu.memory_space<vmem>>, %arg3: memref<4x112x32xf32, #tpu.memory_space<vmem>>, %arg4: memref<4x32x32xf32, #tpu.memory_space<vmem>>, %arg5: memref<4x1x32xf32, #tpu.memory_space<vmem>>, %arg6: memref<32x128xf32, #tpu.memory_space<vmem>>, %arg7: memref<1x128xf32, #tpu.memory_space<vmem>>, %arg8: memref<1xf32, #tpu.memory_space<smem>>, %arg9: memref<64x32xf32, #tpu.memory_space<vmem>>, %arg10: memref<64x32xf32, #tpu.memory_space<vmem>>, %arg11: memref<64x32xf32, #tpu.memory_space<vmem>>, %arg12: memref<64x32xf32, #tpu.memory_space<vmem>>, %arg13: memref<64x32xf32, #tpu.memory_space<vmem>>) attributes {dimension_semantics = [], scalar_prefetch = 0 : i64, scratch_operands = 5 : i64, tpu.core_type = #tpu.core_type<tc>} {
    %c0 = arith.constant 0 : index
    %c0_0 = arith.constant 0 : index
    %0 = vector.load %arg0[%c0, %c0_0] : memref<64x112xf32, #tpu.memory_space<vmem>>, vector<64x112xf32>
    %1 = arith.truncf %0 : vector<64x112xf32> to vector<64x112xbf16>
    %c0_1 = arith.constant 0 : index
    %c0_2 = arith.constant 0 : index
    %c0_3 = arith.constant 0 : index
    %2 = vector.load %arg3[%c0_1, %c0_2, %c0_3] : memref<4x112x32xf32, #tpu.memory_space<vmem>>, vector<1x112x32xf32>
    %3 = vector.shape_cast %2 : vector<1x112x32xf32> to vector<112x32xf32>
    %4 = arith.truncf %3 : vector<112x32xf32> to vector<112x32xbf16>
    %cst = arith.constant dense<0.000000e+00> : vector<64x32xf32>
    %5 = tpu.matmul %1, %4, %cst {dimension_numbers = #tpu.dot_dimension_numbers<[1], [0], [0], [1], [0, 0, 1, 1], [], []>} : vector<64x112xbf16>, vector<112x32xbf16>, vector<64x32xf32> -> vector<64x32xf32>
    %c0_4 = arith.constant 0 : index
    %c0_5 = arith.constant 0 : index
    %c0_6 = arith.constant 0 : index
    %6 = vector.load %arg5[%c0_4, %c0_5, %c0_6] : memref<4x1x32xf32, #tpu.memory_space<vmem>>, vector<1x1x32xf32>
    %7 = vector.shape_cast %6 : vector<1x1x32xf32> to vector<1x32xf32>
    %8 = vector.broadcast %7 : vector<1x32xf32> to vector<64x32xf32>
    %9 = arith.addf %5, %8 : vector<64x32xf32>
    %c0_7 = arith.constant 0 : index
    %c0_8 = arith.constant 0 : index
    %10 = vector.load %arg9[%c0_7, %c0_8] : memref<64x32xf32, #tpu.memory_space<vmem>>, vector<64x32xf32>
    tpu.vector_store %arg9[%c0_7, %c0_8], %9 {strides = array<i32>} : memref<64x32xf32, #tpu.memory_space<vmem>>, vector<64x32xf32>,
    %c1 = arith.constant 1 : index
    %c0_9 = arith.constant 0 : index
    %c0_10 = arith.constant 0 : index
    %11 = vector.load %arg3[%c1, %c0_9, %c0_10] : memref<4x112x32xf32, #tpu.memory_space<vmem>>, vector<1x112x32xf32>
    %12 = vector.shape_cast %11 : vector<1x112x32xf32> to vector<112x32xf32>
    %13 = arith.truncf %12 : vector<112x32xf32> to vector<112x32xbf16>
    %cst_11 = arith.constant dense<0.000000e+00> : vector<64x32xf32>
    %14 = tpu.matmul %1, %13, %cst_11 {dimension_numbers = #tpu.dot_dimension_numbers<[1], [0], [0], [1], [0, 0, 1, 1], [], []>} : vector<64x112xbf16>, vector<112x32xbf16>, vector<64x32xf32> -> vector<64x32xf32>
    %c1_12 = arith.constant 1 : index
    %c0_13 = arith.constant 0 : index
    %c0_14 = arith.constant 0 : index
    %15 = vector.load %arg5[%c1_12, %c0_13, %c0_14] : memref<4x1x32xf32, #tpu.memory_space<vmem>>, vector<1x1x32xf32>
    %16 = vector.shape_cast %15 : vector<1x1x32xf32> to vector<1x32xf32>
    %17 = vector.broadcast %16 : vector<1x32xf32> to vector<64x32xf32>
    %18 = arith.addf %14, %17 : vector<64x32xf32>
    %c0_15 = arith.constant 0 : index
    %c0_16 = arith.constant 0 : index
    %19 = vector.load %arg10[%c0_15, %c0_16] : memref<64x32xf32, #tpu.memory_space<vmem>>, vector<64x32xf32>
    tpu.vector_store %arg10[%c0_15, %c0_16], %18 {strides = array<i32>} : memref<64x32xf32, #tpu.memory_space<vmem>>, vector<64x32xf32>,
    %c2 = arith.constant 2 : index
    %c0_17 = arith.constant 0 : index
    %c0_18 = arith.constant 0 : index
    %20 = vector.load %arg3[%c2, %c0_17, %c0_18] : memref<4x112x32xf32, #tpu.memory_space<vmem>>, vector<1x112x32xf32>
    %21 = vector.shape_cast %20 : vector<1x112x32xf32> to vector<112x32xf32>
    %22 = arith.truncf %21 : vector<112x32xf32> to vector<112x32xbf16>
    %cst_19 = arith.constant dense<0.000000e+00> : vector<64x32xf32>
    %23 = tpu.matmul %1, %22, %cst_19 {dimension_numbers = #tpu.dot_dimension_numbers<[1], [0], [0], [1], [0, 0, 1, 1], [], []>} : vector<64x112xbf16>, vector<112x32xbf16>, vector<64x32xf32> -> vector<64x32xf32>
    %c2_20 = arith.constant 2 : index
    %c0_21 = arith.constant 0 : index
    %c0_22 = arith.constant 0 : index
    %24 = vector.load %arg5[%c2_20, %c0_21, %c0_22] : memref<4x1x32xf32, #tpu.memory_space<vmem>>, vector<1x1x32xf32>
    %25 = vector.shape_cast %24 : vector<1x1x32xf32> to vector<1x32xf32>
    %26 = vector.broadcast %25 : vector<1x32xf32> to vector<64x32xf32>
    %27 = arith.addf %23, %26 : vector<64x32xf32>
    %c0_23 = arith.constant 0 : index
    %c0_24 = arith.constant 0 : index
    %28 = vector.load %arg11[%c0_23, %c0_24] : memref<64x32xf32, #tpu.memory_space<vmem>>, vector<64x32xf32>
    tpu.vector_store %arg11[%c0_23, %c0_24], %27 {strides = array<i32>} : memref<64x32xf32, #tpu.memory_space<vmem>>, vector<64x32xf32>,
    %c3 = arith.constant 3 : index
    %c0_25 = arith.constant 0 : index
    %c0_26 = arith.constant 0 : index
    %29 = vector.load %arg3[%c3, %c0_25, %c0_26] : memref<4x112x32xf32, #tpu.memory_space<vmem>>, vector<1x112x32xf32>
    %30 = vector.shape_cast %29 : vector<1x112x32xf32> to vector<112x32xf32>
    %31 = arith.truncf %30 : vector<112x32xf32> to vector<112x32xbf16>
    %cst_27 = arith.constant dense<0.000000e+00> : vector<64x32xf32>
    %32 = tpu.matmul %1, %31, %cst_27 {dimension_numbers = #tpu.dot_dimension_numbers<[1], [0], [0], [1], [0, 0, 1, 1], [], []>} : vector<64x112xbf16>, vector<112x32xbf16>, vector<64x32xf32> -> vector<64x32xf32>
    %c3_28 = arith.constant 3 : index
    %c0_29 = arith.constant 0 : index
    %c0_30 = arith.constant 0 : index
    %33 = vector.load %arg5[%c3_28, %c0_29, %c0_30] : memref<4x1x32xf32, #tpu.memory_space<vmem>>, vector<1x1x32xf32>
    %34 = vector.shape_cast %33 : vector<1x1x32xf32> to vector<1x32xf32>
    %35 = vector.broadcast %34 : vector<1x32xf32> to vector<64x32xf32>
    %36 = arith.addf %32, %35 : vector<64x32xf32>
    %c0_31 = arith.constant 0 : index
    %c0_32 = arith.constant 0 : index
    %37 = vector.load %arg12[%c0_31, %c0_32] : memref<64x32xf32, #tpu.memory_space<vmem>>, vector<64x32xf32>
    tpu.vector_store %arg12[%c0_31, %c0_32], %36 {strides = array<i32>} : memref<64x32xf32, #tpu.memory_space<vmem>>, vector<64x32xf32>,
    %c0_33 = arith.constant 0 : index
    %c0_34 = arith.constant 0 : index
    %c0_35 = arith.constant 0 : index
    %38 = vector.load %arg4[%c0_33, %c0_34, %c0_35] : memref<4x32x32xf32, #tpu.memory_space<vmem>>, vector<1x32x32xf32>
    %39 = vector.shape_cast %38 : vector<1x32x32xf32> to vector<32x32xf32>
    %40 = arith.truncf %39 : vector<32x32xf32> to vector<32x32xbf16>
    %c1_36 = arith.constant 1 : index
    %c0_37 = arith.constant 0 : index
    %c0_38 = arith.constant 0 : index
    %41 = vector.load %arg4[%c1_36, %c0_37, %c0_38] : memref<4x32x32xf32, #tpu.memory_space<vmem>>, vector<1x32x32xf32>
    %42 = vector.shape_cast %41 : vector<1x32x32xf32> to vector<32x32xf32>
    %43 = arith.truncf %42 : vector<32x32xf32> to vector<32x32xbf16>
    %c2_39 = arith.constant 2 : index
    %c0_40 = arith.constant 0 : index
    %c0_41 = arith.constant 0 : index
    %44 = vector.load %arg4[%c2_39, %c0_40, %c0_41] : memref<4x32x32xf32, #tpu.memory_space<vmem>>, vector<1x32x32xf32>
    %45 = vector.shape_cast %44 : vector<1x32x32xf32> to vector<32x32xf32>
    %46 = arith.truncf %45 : vector<32x32xf32> to vector<32x32xbf16>
    %c3_42 = arith.constant 3 : index
    %c0_43 = arith.constant 0 : index
    %c0_44 = arith.constant 0 : index
    %47 = vector.load %arg4[%c3_42, %c0_43, %c0_44] : memref<4x32x32xf32, #tpu.memory_space<vmem>>, vector<1x32x32xf32>
    %48 = vector.shape_cast %47 : vector<1x32x32xf32> to vector<32x32xf32>
    %49 = arith.truncf %48 : vector<32x32xf32> to vector<32x32xbf16>
    %cst_45 = arith.constant 0.000000e+00 : f32
    %50 = vector.broadcast %cst_45 : f32 to vector<8x32xf32>
    %cst_46 = arith.constant 0.000000e+00 : f32
    %51 = vector.broadcast %cst_46 : f32 to vector<8x32xf32>
    %c0_i32 = arith.constant 0 : i32
    %c8_i32 = arith.constant 8 : i32
    %52 = arith.addi %c0_i32, %c8_i32 : i32
    %c1_i32 = arith.constant 1 : i32
    %53:2 = scf.for %arg14 = %c0_i32 to %52 step %c1_i32 iter_args(%arg15 = %50, %arg16 = %51) -> (vector<8x32xf32>, vector<8x32xf32>)  : i32 {
      %91 = arith.truncf %arg15 : vector<8x32xf32> to vector<8x32xbf16>
      %c8_i32_65 = arith.constant 8 : i32
      %92 = arith.muli %arg14, %c8_i32_65 : i32
      %93 = tpu.assume_multiple %92, 8 : i32
      %94 = arith.index_cast %93 : i32 to index
      %c0_66 = arith.constant 0 : index
      %95 = vector.load %arg9[%94, %c0_66] : memref<64x32xf32, #tpu.memory_space<vmem>>, vector<8x32xf32>
      %cst_67 = arith.constant dense<0.000000e+00> : vector<8x32xf32>
      %96 = tpu.matmul %91, %40, %cst_67 {dimension_numbers = #tpu.dot_dimension_numbers<[1], [0], [0], [1], [0, 0, 1, 1], [], []>} : vector<8x32xbf16>, vector<32x32xbf16>, vector<8x32xf32> -> vector<8x32xf32>
      %97 = arith.addf %95, %96 : vector<8x32xf32>
      %98 = arith.negf %97 : vector<8x32xf32>
      %99 = math.exp %98 : vector<8x32xf32>
      %cst_68 = arith.constant 1.000000e+00 : f32
      %100 = vector.broadcast %cst_68 : f32 to vector<8x32xf32>
      %101 = arith.addf %100, %99 : vector<8x32xf32>
      %102 = arith.divf %100, %101 : vector<8x32xf32>
      %103 = arith.index_cast %93 : i32 to index
      %c0_69 = arith.constant 0 : index
      %104 = vector.load %arg10[%103, %c0_69] : memref<64x32xf32, #tpu.memory_space<vmem>>, vector<8x32xf32>
      %cst_70 = arith.constant dense<0.000000e+00> : vector<8x32xf32>
      %105 = tpu.matmul %91, %43, %cst_70 {dimension_numbers = #tpu.dot_dimension_numbers<[1], [0], [0], [1], [0, 0, 1, 1], [], []>} : vector<8x32xbf16>, vector<32x32xbf16>, vector<8x32xf32> -> vector<8x32xf32>
      %106 = arith.addf %104, %105 : vector<8x32xf32>
      %107 = arith.negf %106 : vector<8x32xf32>
      %108 = math.exp %107 : vector<8x32xf32>
      %cst_71 = arith.constant 1.000000e+00 : f32
      %109 = vector.broadcast %cst_71 : f32 to vector<8x32xf32>
      %110 = arith.addf %109, %108 : vector<8x32xf32>
      %111 = arith.divf %109, %110 : vector<8x32xf32>
      %112 = arith.index_cast %93 : i32 to index
      %c0_72 = arith.constant 0 : index
      %113 = vector.load %arg11[%112, %c0_72] : memref<64x32xf32, #tpu.memory_space<vmem>>, vector<8x32xf32>
      %cst_73 = arith.constant dense<0.000000e+00> : vector<8x32xf32>
      %114 = tpu.matmul %91, %46, %cst_73 {dimension_numbers = #tpu.dot_dimension_numbers<[1], [0], [0], [1], [0, 0, 1, 1], [], []>} : vector<8x32xbf16>, vector<32x32xbf16>, vector<8x32xf32> -> vector<8x32xf32>
      %115 = arith.addf %113, %114 : vector<8x32xf32>
      %116 = math.tanh %115 : vector<8x32xf32>
      %117 = arith.index_cast %93 : i32 to index
      %c0_74 = arith.constant 0 : index
      %118 = vector.load %arg12[%117, %c0_74] : memref<64x32xf32, #tpu.memory_space<vmem>>, vector<8x32xf32>
      %cst_75 = arith.constant dense<0.000000e+00> : vector<8x32xf32>
      %119 = tpu.matmul %91, %49, %cst_75 {dimension_numbers = #tpu.dot_dimension_numbers<[1], [0], [0], [1], [0, 0, 1, 1], [], []>} : vector<8x32xbf16>, vector<32x32xbf16>, vector<8x32xf32> -> vector<8x32xf32>
      %120 = arith.addf %118, %119 : vector<8x32xf32>
      %121 = arith.negf %120 : vector<8x32xf32>
      %122 = math.exp %121 : vector<8x32xf32>
      %cst_76 = arith.constant 1.000000e+00 : f32
      %123 = vector.broadcast %cst_76 : f32 to vector<8x32xf32>
      %124 = arith.addf %123, %122 : vector<8x32xf32>
      %125 = arith.divf %123, %124 : vector<8x32xf32>
      %126 = arith.mulf %111, %arg16 : vector<8x32xf32>
      %127 = arith.mulf %102, %116 : vector<8x32xf32>
      %128 = arith.addf %126, %127 : vector<8x32xf32>
      %129 = math.tanh %128 : vector<8x32xf32>
      %130 = arith.mulf %125, %129 : vector<8x32xf32>
      %131 = arith.index_cast %93 : i32 to index
      %c0_77 = arith.constant 0 : index
      %132 = vector.load %arg13[%131, %c0_77] : memref<64x32xf32, #tpu.memory_space<vmem>>, vector<8x32xf32>
      tpu.vector_store %arg13[%131, %c0_77], %130 {strides = array<i32>} : memref<64x32xf32, #tpu.memory_space<vmem>>, vector<8x32xf32>,
      scf.yield %130, %128 : vector<8x32xf32>, vector<8x32xf32>
    }
    %c8_i32_47 = arith.constant 8 : i32
    %c0_48 = arith.constant 0 : index
    %c0_49 = arith.constant 0 : index
    %54 = vector.load %arg13[%c0_48, %c0_49] : memref<64x32xf32, #tpu.memory_space<vmem>>, vector<64x32xf32>
    %55 = arith.truncf %54 : vector<64x32xf32> to vector<64x32xbf16>
    %c0_50 = arith.constant 0 : index
    %c0_51 = arith.constant 0 : index
    %56 = vector.load %arg6[%c0_50, %c0_51] : memref<32x128xf32, #tpu.memory_space<vmem>>, vector<32x128xf32>
    %57 = arith.truncf %56 : vector<32x128xf32> to vector<32x128xbf16>
    %cst_52 = arith.constant dense<0.000000e+00> : vector<64x128xf32>
    %58 = tpu.matmul %55, %57, %cst_52 {dimension_numbers = #tpu.dot_dimension_numbers<[1], [0], [0], [1], [0, 0, 1, 1], [], []>} : vector<64x32xbf16>, vector<32x128xbf16>, vector<64x128xf32> -> vector<64x128xf32>
    %c0_53 = arith.constant 0 : index
    %c0_54 = arith.constant 0 : index
    %59 = vector.load %arg7[%c0_53, %c0_54] : memref<1x128xf32, #tpu.memory_space<vmem>>, vector<1x128xf32>
    %60 = vector.broadcast %59 : vector<1x128xf32> to vector<64x128xf32>
    %61 = arith.addf %58, %60 : vector<64x128xf32>
    %cst_55 = arith.constant dense<0xFF800000> : vector<64xf32>
    %62 = vector.multi_reduction <maximumf>, %61, %cst_55 [1] : vector<64x128xf32> to vector<64xf32>
    %63 = vector.shape_cast %62 : vector<64xf32> to vector<64x1xf32>
    %64 = vector.broadcast %63 : vector<64x1xf32> to vector<64x128xf32>
    %65 = arith.subf %61, %64 : vector<64x128xf32>
    %66 = math.exp %65 : vector<64x128xf32>
    %cst_56 = arith.constant dense<0.000000e+00> : vector<64xf32>
    %67 = vector.multi_reduction <add>, %66, %cst_56 [1] : vector<64x128xf32> to vector<64xf32>
    %68 = vector.shape_cast %67 : vector<64xf32> to vector<64x1xf32>
    %69 = math.log %68 : vector<64x1xf32>
    %70 = arith.addf %63, %69 : vector<64x1xf32>
    %71 = vector.broadcast %70 : vector<64x1xf32> to vector<64x128xf32>
    %72 = arith.subf %61, %71 : vector<64x128xf32>
    %73 = tpu.iota {dimensions = array<i32: 1>} : vector<64x128xi32>
    %c0_57 = arith.constant 0 : index
    %c0_58 = arith.constant 0 : index
    %74 = vector.load %arg1[%c0_57, %c0_58] : memref<64x1xi32, #tpu.memory_space<vmem>>, vector<64x1xi32>
    %75 = vector.broadcast %74 : vector<64x1xi32> to vector<64x128xi32>
    %76 = arith.cmpi eq, %73, %75 : vector<64x128xi32>
    %77 = arith.extui %76 : vector<64x128xi1> to vector<64x128xi32>
    %78 = arith.sitofp %77 : vector<64x128xi32> to vector<64x128xf32>
    %79 = arith.mulf %78, %72 : vector<64x128xf32>
    %cst_59 = arith.constant dense<0.000000e+00> : vector<64xf32>
    %80 = vector.multi_reduction <add>, %79, %cst_59 [1] : vector<64x128xf32> to vector<64xf32>
    %81 = vector.shape_cast %80 : vector<64xf32> to vector<64x1xf32>
    %cst_60 = arith.constant 0.000000e+00 : f32
    %82 = vector.broadcast %cst_60 : f32 to vector<64x1xf32>
    %83 = arith.subf %82, %81 : vector<64x1xf32>
    %c0_61 = arith.constant 0 : index
    %c0_62 = arith.constant 0 : index
    %84 = vector.load %arg2[%c0_61, %c0_62] : memref<64x1xf32, #tpu.memory_space<vmem>>, vector<64x1xf32>
    %85 = arith.mulf %83, %84 : vector<64x1xf32>
    %86 = vector.shape_cast %85 : vector<64x1xf32> to vector<1x64x1xf32>
    %cst_63 = arith.constant dense<0.000000e+00> : vector<1xf32>
    %87 = vector.multi_reduction <add>, %86, %cst_63 [1, 2] : vector<1x64x1xf32> to vector<1xf32>
    %88 = vector.shape_cast %87 : vector<1xf32> to vector<1x1x1xf32>
    %89 = vector.extract %88[0, 0, 0] : f32 from vector<1x1x1xf32>
    %c0_64 = arith.constant 0 : index
    %90 = memref.load %arg8[%c0_64] : memref<1xf32, #tpu.memory_space<smem>>
    memref.store %89, %arg8[%c0_64] : memref<1xf32, #tpu.memory_space<smem>>
    return
  }
}

</mosaic_0001>

<bundles_post_ra>
// kernel: model_forward.3
= control target key start
LH: loop header
LB: loop body
LE: loop exit
PB: predicated region body
PF: predicated region fallthrough
CT: control target
= control target key end

     0   :  { %s861_s12 = smov 0   ;;  %s977_s0 = inlined_call_operand.vmem [shape: f32[16,12,48], index: 0, kind: input, shape index: {}]   ;;  %s978_s1 = inlined_call_operand.vmem [shape: f32[48,16], index: 1, kind: input, shape index: {}]   ;;  %s979_s2 = inlined_call_operand.vmem [shape: f32[1,16], index: 2, kind: input, shape index: {}]   ;;  %s980_s3 = inlined_call_operand.vmem [shape: f32[16,16], index: 3, kind: output, shape index: {}]  }
   0x1 LB: > { %s867_s13 = sadd.s32 4294967295, %s838_s12   ;;  %p767_p0 = scmp.ge.s32.totalorder %s838_s12, 1  ;;  %s838_s12 = sphi %s861_s12, %s13_s12  }
   0x2   : > { %p139_p1 = scmp.lt.s32.totalorder %s838_s12, 3 }
   0x4   : > { %p140_p2 = pnand %p767_p0, %p139_p1 }
   0x5   : > { %v199_v0 = vld [vmem:[%s978_s1] sm:$0xff] (!%p140_p2)  ;;  %v200_v1 = vld [vmem:[%s978_s1 + $0x8] sm:$0xff] (!%p140_p2)  ;;  %v201_v2 = vld [vmem:[%s978_s1 + $0x10] sm:$0xff] (!%p140_p2)  ;;  %s768_s20 = sshll.u32 (!%p140_p2), %s867_s13, 3  ;;  %v220_v3 = vlaneseq (!%p140_p2)  ;;  %v840_v6 = vmov (!%p140_p2), 1983009808  }
   0x6   : > { %143 = sbr.rel (%p140_p2) target bundleno = 289 (0x121), region = 32  ;;  %v205_v4 = vpack.c.bf16 (!%p140_p2), %v200_v1, %v199_v0  ;;  %v202_v5 = vld [vmem:[%s978_s1 + $0x18] sm:$0xff] (!%p140_p2)  ;;  %p164_p3 = scmp.lt.s32.totalorder (!%p140_p2), %s768_s20, 15  ;;  %v218_v7 = vunpack.c.l.s4 (!%p140_p2), %v840_v6  ;;  %v203_v9 = vld [vmem:[%s978_s1 + $0x20] sm:$0xff] (!%p140_p2)  ;;  %v204_v10 = vld [vmem:[%s978_s1 + $0x28] sm:$0xff] (!%p140_p2)  ;;  %vm446_vm0 = vcmask (!%p140_p2), 392192  }
   0x7   : > { %v206_v8 = vpack.c.bf16 (!%p140_p2), %v202_v5, %v201_v2  ;;  %v221_v11 = vshrl.u32 (!%p140_p2), %v220_v3, 7  ;;  %v207_v13 = vpack.c.bf16 (!%p140_p2), %v204_v10, %v203_v9  ;;  %vm590_vm1 = vcmask (!%p140_p2), 130048   ;;  %p170_p4 = scmp.lt.s32.totalorder (!%p140_p2), %s867_s13, 1 }
   0x8   : > { %799 = vmatprep.subr.bf16.mxu0 (!%p140_p2), %v205_v4  ;;  %817 = vmatprep.subr.bf16.mxu1 (!%p140_p2), %v205_v4  ;;  %v219_v12 = vunpack.c.0.s8 (!%p140_p2), %v218_v7  ;;  %vm592_vm2 = vcmask (!%p140_p2), 125952   ;;  %vm688_vm3 = vcmask (!%p140_p2), 1041409   ;;  %vm691_vm4 = vcmask (!%p140_p2), 1042434  }
   0x9   : > { %800 = vmatpush3.bf16.msra.mxu0 (!%p140_p2), %v205_v4  ;;  %820 = vmatpush3.bf16.msra.mxu1 (!%p140_p2), %v205_v4  ;;  %vm694_vm5 = vcmask (!%p140_p2), 1043459   ;;  %vm697_vm6 = vcmask (!%p140_p2), 1044484   ;;  %vm700_vm7 = vcmask (!%p140_p2), 1045509   ;;  %vm703_vm8 = vcmask (!%p140_p2), 1046534  }
   0xa   : > { %801 = vmatprep.subr.bf16.mxu0 (!%p140_p2), %v206_v8  ;;  %818 = vmatprep.subr.bf16.mxu1 (!%p140_p2), %v206_v8  ;;  %v895_v14 = vsub.s32 (!%p140_p2), %v219_v12, %v221_v11  ;;  %vm706_vm9 = vcmask (!%p140_p2), 1047559  }
   0xd   : > { %s982_s20 = smov (!%p164_p3, %s768_s20), 15  ;;  %802 = vmatpush3.bf16.msra.mxu0 %v206_v8  ;;  %821 = vmatpush3.bf16.msra.mxu1 %v206_v8  ;;  %s984_s13 = smov (!%p170_p4, %s867_s13), 1 }
   0xe   : > { %s789_s27 = sshll.u32 %s982_s20, 4  ;;  %803 = vmatprep.subr.bf16.mxu0 %v207_v13  ;;  %819 = vmatprep.subr.bf16.mxu1 %v207_v13  ;;  %s771_s6 = sshll.u32 %s984_s13, 3 }
   0xf   : > { %s893_s30 = scalar_lea.vmem %s977_s0, %s789_s27  ;;  %s173_s9 = scalar_lea.vmem %s980_s3, %s771_s6 }
  0x10   : > { %v175_v15 = vld [vmem:[%s893_s30] sm:$0xff]  ;;  %v176_v16 = vld [vmem:[%s893_s30 + $0x8] sm:$0xf]  ;;  %v177_v17 = vld [vmem:[%s893_s30 + $0x10] sm:$0xff] }
  0x11   : > { %v178_v18 = vld [vmem:[%s893_s30 + $0x18] sm:$0xf]  ;;  %v191_v19 = vpack.c.bf16 %v176_v16, %v175_v15  ;;  %v772_v20 = vpack.c.bf16 %v176_v16, %v176_v16  ;;  %v179_v21 = vld [vmem:[%s893_s30 + $0x20] sm:$0xff]  ;;  %v180_v22 = vld [vmem:[%s893_s30 + $0x28] sm:$0xf]  ;;  %804 = vmatpush3.bf16.msra.mxu0 %v207_v13  ;;  %822 = vmatpush3.bf16.msra.mxu1 %v207_v13 }
  0x12   : > { %v192_v23 = vpack.c.bf16 %v178_v18, %v177_v17  ;;  %v773_v24 = vpack.c.bf16 %v178_v18, %v178_v18  ;;  %v181_v25 = vld [vmem:[%s893_s30 + $0x30] sm:$0xff]  ;;  %v182_v26 = vld [vmem:[%s893_s30 + $0x38] sm:$0xf]  ;;  %v193_v27 = vpack.c.bf16 %v180_v22, %v179_v21  ;;  %v774_v31 = vpack.c.bf16 %v180_v22, %v180_v22  ;;  %v183_v36 = vld [vmem:[%s893_s30 + $0x40] sm:$0xff] }
  0x13   : > { %v223_v28 = vrot.slane %v191_v19, %v895_v14  ;;  %v230_v29 = vrot.slane %v772_v20, %v895_v14  ;;  %v194_v30 = vpack.c.bf16 %v182_v26, %v181_v25  ;;  %v775_v33 = vpack.c.bf16 %v182_v26, %v182_v26  ;;  %v184_v37 = vld [vmem:[%s893_s30 + $0x48] sm:$0xf]  ;;  %v185_v41 = vld [vmem:[%s893_s30 + $0x50] sm:$0xff]  ;;  %v186_v42 = vld [vmem:[%s893_s30 + $0x58] sm:$0xf] }
  0x14   : > { %v239_v32 = vrot.slane %v192_v23, %v895_v14  ;;  %v246_v34 = vrot.slane %v773_v24, %v895_v14  ;;  %v255_v35 = vrot.slane %v193_v27, %v895_v14  ;;  %v262_v39 = vrot.slane %v774_v31, %v895_v14  ;;  %v187_v55 = vld [vmem:[%s893_s30 + $0x60] sm:$0xff]  ;;  %v188_v56 = vld [vmem:[%s893_s30 + $0x68] sm:$0xf]  ;;  %v189_v1 = vld [vmem:[%s893_s30 + $0x70] sm:$0xff] }
  0x15   : > { %v231_v38 = vcombine.high %v223_v28, %v223_v28  ;;  %v271_v40 = vrot.slane %v194_v30, %v895_v14  ;;  %v278_v45 = vrot.slane %v775_v33, %v895_v14  ;;  %v195_v50 = vpack.c.bf16 %v184_v37, %v183_v36  ;;  %v190_v2 = vld [vmem:[%s893_s30 + $0x78] sm:$0xf] }
  0x16   : > { %v247_v43 = vcombine.high %v239_v32, %v239_v32  ;;  %v345_v44 = vcombine.low %v230_v29, %v239_v32  ;;  %v263_v46 = vcombine.high %v255_v35, %v255_v35  ;;  %v196_v54 = vpack.c.bf16 %v186_v42, %v185_v41 }
  0x17   : > { %v344_v47 = vcombine.low %v223_v28, %v231_v38  ;;  %v279_v48 = vcombine.high %v271_v40, %v271_v40  ;;  %v378_v49 = vcombine.low %v262_v39, %v271_v40  ;;  %v776_v60 = vpack.c.bf16 %v184_v37, %v184_v37 }
  0x18   : > { %v359_v51 = vrot.slane %v345_v44, %v895_v14  ;;  %v361_v52 = vcombine.low %v247_v43, %v246_v34  ;;  %v362_v53 = vcombine.low %v255_v35, %v263_v46  ;;  %v287_v63 = vrot.slane %v195_v50, %v895_v14 }
  0x19   : > { %v352_v57 = vrot.slane %v344_v47, %v895_v14  ;;  %v379_v58 = vcombine.low %v279_v48, %v278_v45  ;;  %v386_v59 = vrot.slane %v378_v49, %v895_v14  ;;  %v303_v0 = vrot.slane %v196_v54, %v895_v14 }
  0x1a   : > { %v369_v61 = vrot.slane %v361_v52, %v895_v14  ;;  %v376_v62 = vrot.slane %v362_v53, %v895_v14  ;;  %v294_v5 = vrot.slane %v776_v60, %v895_v14  ;;  %v197_v6 = vpack.c.bf16 %v188_v56, %v187_v55 }
  0x1b   : > { %v360_v3 = vcombine.low %v352_v57, %v359_v51  ;;  %v393_v4 = vrot.slane %v379_v58, %v895_v14  ;;  %v295_v8 = vcombine.high %v287_v63, %v287_v63  ;;  %v777_v9 = vpack.c.bf16 %v186_v42, %v186_v42 }
  0x1c   : > { %v377_v7 = vcombine.low %v369_v61, %v376_v62  ;;  %v311_v10 = vcombine.high %v303_v0, %v303_v0  ;;  %v396_v12 = vcombine.low %v294_v5, %v303_v0  ;;  %v319_v13 = vrot.slane %v197_v6, %v895_v14 }
  0x1d   : > { %805 = vmatprep.mubr.msk.bf16.mxu0 %vm446_vm0, %v360_v3  ;;  %v394_v11 = vcombine.low %v386_v59, %v393_v4  ;;  %v198_v15 = vpack.c.bf16 %v190_v2, %v189_v1  ;;  %v395_v16 = vcombine.low %v287_v63, %v295_v8  ;;  %v310_v17 = vrot.slane %v777_v9, %v895_v14 }
  0x1e   : > { %806 = vmatmul.mubr.msk.bf16.vlgmr.msra.gmra.mrb[0].mxu0 %vm446_vm0, %v377_v7  ;;  %v778_v18 = vpack.c.bf16 %v188_v56, %v188_v56  ;;  %v779_v19 = vpack.c.bf16 %v190_v2, %v190_v2  ;;  %v410_v20 = vrot.slane %v396_v12, %v895_v14  ;;  %v327_v21 = vcombine.high %v319_v13, %v319_v13 }
  0x1f   : > { %809 = vmatprep.mubr.msk.bf16.mxu1 %vm446_vm0, %v394_v11  ;;  %v335_v22 = vrot.slane %v198_v15, %v895_v14  ;;  %v403_v23 = vrot.slane %v395_v16, %v895_v14  ;;  %v412_v24 = vcombine.low %v311_v10, %v310_v17 }
  0x20   : > { %v326_v25 = vrot.slane %v778_v18, %v895_v14  ;;  %v342_v26 = vrot.slane %v779_v19, %v895_v14  ;;  %v413_v27 = vcombine.low %v319_v13, %v327_v21 }
  0x21   : > { %v343_v28 = vcombine.high %v335_v22, %v335_v22  ;;  %v411_v29 = vcombine.low %v403_v23, %v410_v20  ;;  %v420_v30 = vrot.slane %v412_v24, %v895_v14 }
  0x22   : > { %v429_v31 = vcombine.low %v326_v25, %v335_v22  ;;  %v427_v32 = vrot.slane %v413_v27, %v895_v14 }
  0x23   : > { %v430_v33 = vcombine.low %v343_v28, %v342_v26  ;;  %810 = vmatmul.mubr.msk.bf16.vlgmr.msra.gmra.mrb[0].mxu1 %vm446_vm0, %v411_v29 }
  0x24   : > { %v437_v34 = vrot.slane %v429_v31, %v895_v14  ;;  %v428_v35 = vcombine.low %v420_v30, %v427_v32 }
  0x25   : > { %v444_v36 = vrot.slane %v430_v33, %v895_v14 }
  0x26   : > { %813 = vmatprep.mubr.msk.bf16.mxu1 %vm446_vm0, %v428_v35 }
  0x27   : > { %v445_v37 = vcombine.low %v437_v34, %v444_v36 }
  0x2b   : > { %814 = vmatmul.mubr.msk.bf16.gmra.mrb[4].mxu1 %vm446_vm0, %v445_v37 }
  0xf1   : > { %v807_v38 = vpop.f32.mrb[0].mxu0 }
  0xf2   : > { %v499_v39 = vpop.f32.mrb[1].mxu0  ;;  %v560_v46 = vcombine.high %v807_v38, %v807_v38 }
  0xf3   : > { %v558_v40 = vcombine.high %v499_v39, %v499_v39  ;;  %v808_v41 = vpop.f32.mrb[2].mxu0 }
  0xf4   : > { %v561_v42 = vcombine.high %v808_v41, %v808_v41  ;;  %v502_v43 = vpop.f32.mrb[3].mxu0  ;;  %v602_v59 = vsel %vm592_vm2, %v560_v46, -inf }
  0xf5   : > { %v574_v44 = vcombine.low %v499_v39, %v558_v40  ;;  %v559_v45 = vcombine.high %v502_v43, %v502_v43  ;;  %v593_v50 = vsel %vm592_vm2, %v502_v43, -inf }
  0xf6   : > { %v576_v47 = vcombine.low %v808_v41, %v561_v42  ;;  %v811_v48 = vpop.f32.mrb[0].mxu1 }
  0xf7   : > { %v575_v49 = vcombine.low %v559_v45, %v807_v38  ;;  %v591_v14 = vsel %vm590_vm1, %v574_v44, -inf  ;;  %v564_v51 = vcombine.high %v811_v48, %v811_v48  ;;  %v515_v52 = vpop.f32.mrb[1].mxu1 }
  0xf8   : > { %v610_v53 = vsel %vm590_vm1, %v576_v47, -inf  ;;  %v594_v54 = vmax.f32 %v591_v14, %v593_v50  ;;  %v562_v55 = vcombine.high %v515_v52, %v515_v52  ;;  %v611_v56 = vsel %vm592_vm2, %v515_v52, -inf  ;;  %v812_v57 = vpop.f32.mrb[2].mxu1  ;;  %v786_v47 = vld [vmem:[%s979_s2] ss:$0 sm:$0xff] }
  0xf9   : > { %v601_v58 = vsel %vm590_vm1, %v575_v49, -inf  ;;  %v578_v60 = vcombine.low %v811_v48, %v564_v51  ;;  %v612_v61 = vmax.f32 %v610_v53, %v611_v56  ;;  %v518_v62 = vpop.f32.mrb[3].mxu1  ;;  %v629_v5 = vsel %vm592_vm2, %v812_v57, -inf }
  0xfa   : > { %v595_v63 = vrot.slane %v594_v54, 4  ;;  %v603_v0 = vmax.f32 %v601_v58, %v602_v59  ;;  %v563_v1 = vcombine.high %v518_v62, %v518_v62  ;;  %v577_v2 = vcombine.low %v562_v55, %v518_v62 }
  0xfb   : > { %v613_v3 = vrot.slane %v612_v61, 4  ;;  %v628_v4 = vsel %vm590_vm1, %v578_v60, -inf  ;;  %v565_v19 = vcombine.high %v812_v57, %v812_v57 }
  0xfc   : > { %v630_v6 = vmax.f32 %v628_v4, %v629_v5  ;;  %v596_v7 = vmax.f32 %v594_v54, %v595_v63  ;;  %v604_v8 = vrot.slane %v603_v0, 4  ;;  %v619_v9 = vsel %vm590_vm1, %v577_v2, -inf }
  0xfd   : > { %v614_v10 = vmax.f32 %v612_v61, %v613_v3  ;;  %v620_v11 = vsel %vm592_vm2, %v563_v1, -inf }
  0xfe   : > { %v631_v12 = vrot.slane %v630_v6, 4  ;;  %v597_v13 = vrot.slane %v596_v7, 2  ;;  %v605_v15 = vmax.f32 %v603_v0, %v604_v8  ;;  %v621_v16 = vmax.f32 %v619_v9, %v620_v11  ;;  %v815_v17 = vpop.f32.mrb[4].mxu1 }
  0xff   : > { %v615_v18 = vrot.slane %v614_v10, 2  ;;  %v568_v20 = vcombine.high %v815_v17, %v815_v17  ;;  %v531_v21 = vpop.f32.mrb[5].mxu1  ;;  %v647_v58 = vsel %vm592_vm2, %v815_v17, -inf }
 0x100   : > { %v632_v22 = vmax.f32 %v630_v6, %v631_v12  ;;  %v598_v23 = vmax.f32 %v596_v7, %v597_v13  ;;  %v606_v24 = vrot.slane %v605_v15, 2  ;;  %v622_v25 = vrot.slane %v621_v16, 4  ;;  %v816_v26 = vpop.f32.mrb[6].mxu1 }
 0x101   : > { %v616_v27 = vmax.f32 %v614_v10, %v615_v18  ;;  %v566_v28 = vcombine.high %v531_v21, %v531_v21  ;;  %v579_v29 = vcombine.low %v565_v19, %v531_v21  ;;  %v569_v30 = vcombine.high %v816_v26, %v816_v26  ;;  %v534_v31 = vpop.f32.mrb[7].mxu1 }
 0x102   : > { %v633_v32 = vrot.slane %v632_v22, 2  ;;  %v599_v33 = vrot.slane %v598_v23, 1  ;;  %v607_v34 = vmax.f32 %v605_v15, %v606_v24  ;;  %v623_v35 = vmax.f32 %v621_v16, %v622_v25 }
 0x103   : > { %v617_v36 = vrot.slane %v616_v27, 1  ;;  %v637_v37 = vsel %vm590_vm1, %v579_v29, -inf  ;;  %v638_v38 = vsel %vm592_vm2, %v566_v28, -inf  ;;  %v581_v39 = vcombine.low %v568_v20, %v816_v26 }
 0x104   : > { %v634_v40 = vmax.f32 %v632_v22, %v633_v32  ;;  %v608_v41 = vrot.slane %v607_v34, 1  ;;  %v624_v42 = vrot.slane %v623_v35, 2  ;;  %v639_v44 = vmax.f32 %v637_v37, %v638_v38 }
 0x105   : > { %v618_v43 = vmax.f32 %v616_v27, %v617_v36  ;;  %v655_v45 = vsel %vm590_vm1, %v581_v39, -inf  ;;  %v656_v46 = vsel %vm592_vm2, %v569_v30, -inf  ;;  %v600_v49 = vmax.f32 %v598_v23, %v599_v33 }
 0x106   : > { %v635_v48 = vrot.slane %v634_v40, 1  ;;  %v609_v14 = vmax.f32 %v607_v34, %v608_v41  ;;  %v625_v50 = vmax.f32 %v623_v35, %v624_v42  ;;  %v640_v52 = vrot.slane %v639_v44, 4 }
 0x107   : > { %v673_v51 = vadd.f32 %v786_v47, %v618_v43  ;;  %v657_v53 = vmax.f32 %v655_v45, %v656_v46  ;;  %v567_v54 = vcombine.high %v534_v31, %v534_v31  ;;  %v671_v63 = vadd.f32 %v786_v47, %v600_v49 }
 0x108   : > { %v636_v55 = vmax.f32 %v634_v40, %v635_v48  ;;  %v672_v56 = vadd.f32 %v786_v47, %v609_v14  ;;  %v626_v57 = vrot.slane %v625_v50, 1  ;;  %v641_v59 = vmax.f32 %v639_v44, %v640_v52 }
 0x109   : > { %v658_v60 = vrot.slane %v657_v53, 4  ;;  %v580_v61 = vcombine.low %v534_v31, %v567_v54  ;;  %v690_v62 = vrot.slane %v673_v51, 6 }
 0x10a   : > { %v687_v0 = vrot.slane %v672_v56, 7  ;;  %v627_v1 = vmax.f32 %v625_v50, %v626_v57  ;;  %v675_v2 = vadd.f32 %v786_v47, %v636_v55  ;;  %v642_v3 = vrot.slane %v641_v59, 2 }
 0x10b   : > { %v659_v4 = vmax.f32 %v657_v53, %v658_v60  ;;  %v646_v5 = vsel %vm590_vm1, %v580_v61, -inf }
 0x10c   : > { %v689_v6 = vsel %vm688_vm3, %v687_v0, %v671_v63  ;;  %v674_v7 = vadd.f32 %v786_v47, %v627_v1  ;;  %v648_v8 = vmax.f32 %v646_v5, %v647_v58  ;;  %v643_v10 = vmax.f32 %v641_v59, %v642_v3 }
 0x10d   : > { %v692_v9 = vsel %vm691_vm4, %v690_v62, %v689_v6  ;;  %v660_v11 = vrot.slane %v659_v4, 2  ;;  %v696_v15 = vrot.slane %v675_v2, 4 }
 0x10e   : > { %v693_v12 = vrot.slane %v674_v7, 5  ;;  %v649_v13 = vrot.slane %v648_v8, 4  ;;  %v644_v16 = vrot.slane %v643_v10, 1 }
 0x10f   : > { %v661_v17 = vmax.f32 %v659_v4, %v660_v11 }
 0x110   : > { %v695_v18 = vsel %vm694_vm5, %v693_v12, %v692_v9  ;;  %v650_v19 = vmax.f32 %v648_v8, %v649_v13  ;;  %v645_v20 = vmax.f32 %v643_v10, %v644_v16 }
 0x111   : > { %v698_v21 = vsel %vm697_vm6, %v696_v15, %v695_v18  ;;  %v662_v22 = vrot.slane %v661_v17, 1 }
 0x112   : > { %v651_v23 = vrot.slane %v650_v19, 2  ;;  %v676_v24 = vadd.f32 %v786_v47, %v645_v20 }
 0x113   : > { %v663_v27 = vmax.f32 %v661_v17, %v662_v22 }
 0x114   : > { %v652_v25 = vmax.f32 %v650_v19, %v651_v23  ;;  %v699_v26 = vrot.slane %v676_v24, 3 }
 0x115   : > { %v678_v31 = vadd.f32 %v786_v47, %v663_v27 }
 0x116   : > { %v653_v28 = vrot.slane %v652_v25, 1  ;;  %v701_v29 = vsel %vm700_vm7, %v699_v26, %v698_v21 }
 0x117   : > { %v705_v34 = vrot.slane %v678_v31, 1 }
 0x118   : > { %v654_v30 = vmax.f32 %v652_v25, %v653_v28 }
 0x11a   : > { %v677_v32 = vadd.f32 %v786_v47, %v654_v30 }
 0x11c   : > { %v702_v33 = vrot.slane %v677_v32, 2 }
 0x11e   : > { %v704_v35 = vsel %vm703_vm8, %v702_v33, %v701_v29 }
 0x11f   : > { %v707_v36 = vsel %vm706_vm9, %v705_v34, %v704_v35 }
 0x120   : > { %709 = vst.msk [vmem:[%s173_s9] sm:$0xff] %vm590_vm1, %v707_v36 }
 0x121 PF: > { %s13_s12 = sadd.s32 1, %s838_s12  }
 0x122   : > { %p10_p5 = scmp.ge.s32.totalorder %s13_s12, 4  }
 0x124   :  { %12 = sbr.rel (!%p10_p5) target bundleno = 1 (0x1), region = 62 }

// kernel: model_forward.4
= control target key start
LH: loop header
LB: loop body
LE: loop exit
PB: predicated region body
PF: predicated region fallthrough
CT: control target
= control target key end

     0   :  { %v316_v0 = vmov 0   ;;  %vm55_vm0 = vcmask 130048   ;;  %vm100_vm1 = vcmask 261120   ;;  %s579_s1 = inlined_call_operand.vmem [shape: f32[3,144,32], index: 1, kind: input, shape index: {}]   ;;  %s580_s0 = inlined_call_operand.vmem [shape: f32[16,144], index: 0, kind: input, shape index: {}]   ;;  %s581_s2 = inlined_call_operand.vmem [shape: f32[3,1,32], index: 2, kind: input, shape index: {}]   ;;  %s582_s3 = inlined_call_operand.vmem [shape: f32[3,16,32], index: 3, kind: output, shape index: {}]  }
   0x1   :  { %59 = vmatprep.subr.bf16.mxu0 %v316_v0  ;;  %v21_v1 = vld [vmem:[%s579_s1] sm:$0xff]  ;;  %v22_v2 = vld [vmem:[%s579_s1 + $0x8] sm:$0xff]  ;;  %v23_v3 = vld [vmem:[%s579_s1 + $0x10] sm:$0xff]  ;;  %139 = vmatprep.subr.bf16.mxu1 %v316_v0 }
   0x2   :  { %v39_v4 = vpack.c.bf16 %v22_v2, %v21_v1  ;;  %v24_v5 = vld [vmem:[%s579_s1 + $0x18] sm:$0xff]  ;;  %v25_v7 = vld [vmem:[%s579_s1 + $0x20] sm:$0xff]  ;;  %v26_v8 = vld [vmem:[%s579_s1 + $0x28] sm:$0xff] }
   0x3   :  { %v40_v6 = vpack.c.bf16 %v24_v5, %v23_v3  ;;  %v269_v9 = vld [vmem:[%s579_s1 + $0x90] sm:$0xff]  ;;  %v270_v10 = vld [vmem:[%s579_s1 + $0x98] sm:$0xff]  ;;  %v16_v11 = vld [vmem:[%s580_s0 + $0x8] sm:$0xff]  ;;  %v41_v12 = vpack.c.bf16 %v26_v8, %v25_v7 }
   0x4   :  { %60 = vmatpush1.bf16.msra.mxu0 %v39_v4  ;;  %v122_v13 = vpack.c.bf16 %v270_v10, %v269_v9  ;;  %v18_v14 = vld [vmem:[%s580_s0 + $0x18] sm:$0xff]  ;;  %v27_v15 = vld [vmem:[%s579_s1 + $0x30] sm:$0xff]  ;;  %v271_v18 = vld [vmem:[%s579_s1 + $0xa0] sm:$0xff] }
   0x5   :  { %61 = vmatprep.subr.bf16.mxu0 %v316_v0  ;;  %v28_v16 = vld [vmem:[%s579_s1 + $0x38] sm:$0xff]  ;;  %v377_v17 = vpack.c.bf16 %v18_v14, %v16_v11  ;;  %v272_v19 = vld [vmem:[%s579_s1 + $0xa8] sm:$0xff]  ;;  %v273_v21 = vld [vmem:[%s579_s1 + $0xb0] sm:$0xff] }
   0x6   :  { %140 = vmatpush1.bf16.msra.mxu1 %v122_v13  ;;  %v123_v20 = vpack.c.bf16 %v272_v19, %v271_v18  ;;  %v274_v22 = vld [vmem:[%s579_s1 + $0xb8] sm:$0xff]  ;;  %v42_v23 = vpack.c.bf16 %v28_v16, %v27_v15  ;;  %v29_v24 = vld [vmem:[%s579_s1 + $0x40] sm:$0xff]  ;;  %v30_v25 = vld [vmem:[%s579_s1 + $0x48] sm:$0xff] }
   0x7   :  { %268 = vmatprep.mubr.msk.bf16.mxu0 %vm55_vm0, %v377_v17  ;;  %141 = vmatprep.subr.bf16.mxu1 %v316_v0  ;;  %v124_v26 = vpack.c.bf16 %v274_v22, %v273_v21  ;;  %v275_v27 = vld [vmem:[%s579_s1 + $0xc0] sm:$0xff]  ;;  %v276_v28 = vld [vmem:[%s579_s1 + $0xc8] sm:$0xff]  ;;  %v43_v29 = vpack.c.bf16 %v30_v25, %v29_v24  ;;  %v31_v30 = vld [vmem:[%s579_s1 + $0x50] sm:$0xff] }
   0x8   :  { %62 = vmatpush1.bf16.msra.mxu0 %v40_v6  ;;  %289 = vmatprep.mubr.msk.bf16.mxu1 %vm55_vm0, %v377_v17  ;;  %v32_v31 = vld [vmem:[%s579_s1 + $0x58] sm:$0xff]  ;;  %v125_v32 = vpack.c.bf16 %v276_v28, %v275_v27  ;;  %v277_v33 = vld [vmem:[%s579_s1 + $0xd0] sm:$0xff]  ;;  %v33_v36 = vld [vmem:[%s579_s1 + $0x60] sm:$0xff] }
   0x9   :  { %63 = vmatprep.subr.bf16.mxu0 %v316_v0  ;;  %v278_v34 = vld [vmem:[%s579_s1 + $0xd8] sm:$0xff]  ;;  %v44_v35 = vpack.c.bf16 %v32_v31, %v31_v30  ;;  %v34_v37 = vld [vmem:[%s579_s1 + $0x68] sm:$0xff]  ;;  %v279_v39 = vld [vmem:[%s579_s1 + $0xe0] sm:$0xff] }
   0xa   :  { %142 = vmatpush1.bf16.msra.mxu1 %v123_v20  ;;  %v126_v38 = vpack.c.bf16 %v278_v34, %v277_v33  ;;  %v280_v40 = vld [vmem:[%s579_s1 + $0xe8] sm:$0xff]  ;;  %v45_v41 = vpack.c.bf16 %v34_v37, %v33_v36  ;;  %v35_v42 = vld [vmem:[%s579_s1 + $0x70] sm:$0xff]  ;;  %v36_v43 = vld [vmem:[%s579_s1 + $0x78] sm:$0xff] }
   0xb   :  { %143 = vmatprep.subr.bf16.mxu1 %v316_v0  ;;  %v127_v44 = vpack.c.bf16 %v280_v40, %v279_v39  ;;  %v281_v45 = vld [vmem:[%s579_s1 + $0xf0] sm:$0xff]  ;;  %v282_v46 = vld [vmem:[%s579_s1 + $0xf8] sm:$0xff]  ;;  %v46_v47 = vpack.c.bf16 %v36_v43, %v35_v42  ;;  %v37_v48 = vld [vmem:[%s579_s1 + $0x80] sm:$0xff] }
   0xc   :  { %64 = vmatpush1.bf16.msra.mxu0 %v41_v12  ;;  %v38_v49 = vld [vmem:[%s579_s1 + $0x88] sm:$0xff]  ;;  %v128_v50 = vpack.c.bf16 %v282_v46, %v281_v45  ;;  %v283_v51 = vld [vmem:[%s579_s1 + $0x100] sm:$0xff]  ;;  %v17_v55 = vld [vmem:[%s580_s0 + $0x10] sm:$0xff] }
   0xd   :  { %65 = vmatprep.subr.bf16.mxu0 %v316_v0  ;;  %v284_v52 = vld [vmem:[%s579_s1 + $0x108] sm:$0xff]  ;;  %v47_v53 = vpack.c.bf16 %v38_v49, %v37_v48  ;;  %v15_v54 = vld [vmem:[%s580_s0] sm:$0xff]  ;;  %v285_v60 = vld [vmem:[%s579_s1 + $0x110] sm:$0xff] }
   0xe   :  { %144 = vmatpush1.bf16.msra.mxu1 %v124_v26  ;;  %v292_v56 = vld [vmem:[%s579_s1 + $0x120] sm:$0xff]  ;;  %v293_v57 = vld [vmem:[%s579_s1 + $0x128] sm:$0xff]  ;;  %v129_v58 = vpack.c.bf16 %v284_v52, %v283_v51  ;;  %v19_v59 = vpack.c.bf16 %v17_v55, %v15_v54  ;;  %v286_v61 = vld [vmem:[%s579_s1 + $0x118] sm:$0xff] }
   0xf   :  { %145 = vmatprep.subr.bf16.mxu1 %v316_v0  ;;  %v202_v62 = vpack.c.bf16 %v293_v57, %v292_v56  ;;  %v294_v63 = vld [vmem:[%s579_s1 + $0x130] sm:$0xff]  ;;  %v295_v1 = vld [vmem:[%s579_s1 + $0x138] sm:$0xff]  ;;  %v130_v2 = vpack.c.bf16 %v286_v61, %v285_v60  ;;  %v296_v4 = vld [vmem:[%s579_s1 + $0x140] sm:$0xff] }
  0x10   :  { %66 = vmatpush1.bf16.msra.mxu0 %v42_v23  ;;  %v203_v3 = vpack.c.bf16 %v295_v1, %v294_v63  ;;  %v297_v5 = vld [vmem:[%s579_s1 + $0x148] sm:$0xff]  ;;  %v298_v7 = vld [vmem:[%s579_s1 + $0x150] sm:$0xff]  ;;  %v299_v8 = vld [vmem:[%s579_s1 + $0x158] sm:$0xff] }
  0x11   :  { %67 = vmatprep.subr.bf16.mxu0 %v316_v0  ;;  %v204_v6 = vpack.c.bf16 %v297_v5, %v296_v4  ;;  %v205_v9 = vpack.c.bf16 %v299_v8, %v298_v7  ;;  %v300_v10 = vld [vmem:[%s579_s1 + $0x160] sm:$0xff]  ;;  %v301_v11 = vld [vmem:[%s579_s1 + $0x168] sm:$0xff]  ;;  %v302_v13 = vld [vmem:[%s579_s1 + $0x170] sm:$0xff] }
  0x12   :  { %146 = vmatpush1.bf16.msra.mxu1 %v125_v32  ;;  %v206_v12 = vpack.c.bf16 %v301_v11, %v300_v10  ;;  %v303_v14 = vld [vmem:[%s579_s1 + $0x178] sm:$0xff]  ;;  %v304_v16 = vld [vmem:[%s579_s1 + $0x180] sm:$0xff]  ;;  %v306_v19 = vld [vmem:[%s579_s1 + $0x190] sm:$0xff] }
  0x13   :  { %147 = vmatprep.subr.bf16.mxu1 %v316_v0  ;;  %v207_v15 = vpack.c.bf16 %v303_v14, %v302_v13  ;;  %v307_v20 = vld [vmem:[%s579_s1 + $0x198] sm:$0xff]  ;;  %v308_v22 = vld [vmem:[%s579_s1 + $0x1a0] sm:$0xff]  ;;  %v309_v23 = vld [vmem:[%s579_s1 + $0x1a8] sm:$0xff] }
  0x14   :  { %68 = vmatpush1.bf16.msra.mxu0 %v43_v29  ;;  %v209_v21 = vpack.c.bf16 %v307_v20, %v306_v19  ;;  %v210_v24 = vpack.c.bf16 %v309_v23, %v308_v22  ;;  %v267_v25 = vld [vmem:[%s581_s2] ss:$0 sm:$0xff] }
  0x15   :  { %69 = vmatprep.subr.bf16.mxu0 %v316_v0 }
  0x16   :  { %148 = vmatpush1.bf16.msra.mxu1 %v126_v38  ;;  %v311_v38 = vld [vmem:[%s581_s2 + $0x2] ss:$0 sm:$0xff] }
  0x17   :  { %149 = vmatprep.subr.bf16.mxu1 %v316_v0 }
  0x18   :  { %70 = vmatpush1.bf16.msra.mxu0 %v44_v35 }
  0x19   :  { %71 = vmatprep.subr.bf16.mxu0 %v316_v0 }
  0x1a   :  { %150 = vmatpush1.bf16.msra.mxu1 %v127_v44 }
  0x1b   :  { %151 = vmatprep.subr.bf16.mxu1 %v316_v0 }
  0x1c   :  { %72 = vmatpush1.bf16.msra.mxu0 %v45_v41 }
  0x1d   :  { %73 = vmatprep.subr.bf16.mxu0 %v316_v0 }
  0x1e   :  { %152 = vmatpush1.bf16.msra.mxu1 %v128_v50 }
  0x1f   :  { %153 = vmatprep.subr.bf16.mxu1 %v316_v0 }
  0x20   :  { %74 = vmatpush1.bf16.msra.mxu0 %v46_v47 }
  0x21   :  { %75 = vmatprep.subr.bf16.mxu0 %v316_v0 }
  0x22   :  { %154 = vmatpush1.bf16.msra.mxu1 %v129_v58 }
  0x23   :  { %155 = vmatprep.subr.bf16.mxu1 %v316_v0 }
  0x24   :  { %76 = vmatpush1.bf16.msra.mxu0 %v47_v53 }
  0x25   :  { %219 = vmatprep.subr.bf16.mxu0 %v316_v0 }
  0x26   :  { %156 = vmatpush1.bf16.msra.mxu1 %v130_v2 }
  0x27   :  { %92 = vmatmul.mubr.bf16.vlgmr.msra.gmra.mrb[0].mxu0 %v19_v59 }
  0x28   :  { %220 = vmatpush1.bf16.msra.mxu0 %v202_v62  ;;  %312 = vmatprep.mubr.msk.bf16.mxu0 %vm55_vm0, %v377_v17  ;;  %v305_v17 = vld [vmem:[%s579_s1 + $0x188] sm:$0xff] }
  0x29   :  { %221 = vmatprep.subr.bf16.mxu0 %v316_v0  ;;  %172 = vmatmul.mubr.bf16.vlgmr.msra.gmra.mrb[0].mxu1 %v19_v59  ;;  %v208_v18 = vpack.c.bf16 %v305_v17, %v304_v16 }
  0x2c   :  { %222 = vmatpush1.bf16.msra.mxu0 %v203_v3 }
  0x2d   :  { %223 = vmatprep.subr.bf16.mxu0 %v316_v0 }
  0x30   :  { %224 = vmatpush1.bf16.msra.mxu0 %v204_v6 }
  0x31   :  { %225 = vmatprep.subr.bf16.mxu0 %v316_v0 }
  0x34   :  { %226 = vmatpush1.bf16.msra.mxu0 %v205_v9 }
  0x35   :  { %227 = vmatprep.subr.bf16.mxu0 %v316_v0 }
  0x38   :  { %228 = vmatpush1.bf16.msra.mxu0 %v206_v12 }
  0x39   :  { %229 = vmatprep.subr.bf16.mxu0 %v316_v0 }
  0x3c   :  { %230 = vmatpush1.bf16.msra.mxu0 %v207_v15 }
  0x3d   :  { %231 = vmatprep.subr.bf16.mxu0 %v316_v0 }
  0x40   :  { %232 = vmatpush1.bf16.msra.mxu0 %v208_v18 }
  0x41   :  { %233 = vmatprep.subr.bf16.mxu0 %v316_v0 }
  0x44   :  { %234 = vmatpush1.bf16.msra.mxu0 %v209_v21 }
  0x45   :  { %235 = vmatprep.subr.bf16.mxu0 %v316_v0  ;;  %v288_v0 = vld [vmem:[%s581_s2 + $0x1] ss:$0 sm:$0xff] }
  0x48   :  { %236 = vmatpush1.bf16.msra.mxu0 %v210_v24 }
  0x4b   :  { %252 = vmatmul.mubr.bf16.vlgmr.msra.gmra.mrb[4].mxu0 %v19_v59 }
  0xfa   :  { %v93_v26 = vpop.f32.mrb[0].mxu0 }
  0xfb   :  { %v94_v27 = vadd.f32 %v267_v25, %v93_v26  ;;  %v95_v28 = vpop.f32.mrb[1].mxu0 }
  0xfc   :  { %v96_v29 = vpop.f32.mrb[2].mxu0  ;;  %v173_v32 = vpop.f32.mrb[0].mxu1 }
  0xfd   :  { %101 = vst.msk [vmem:[%s582_s3] sm:$0xff] %vm100_vm1, %v94_v27  ;;  %v97_v30 = vadd.f32 %v267_v25, %v96_v29  ;;  %v98_v31 = vpop.f32.mrb[3].mxu0  ;;  %v174_v33 = vadd.f32 %v288_v0, %v173_v32  ;;  %v175_v34 = vpop.f32.mrb[1].mxu1 }
  0xfe   :  { %v176_v35 = vpop.f32.mrb[2].mxu1 }
  0xff   :  { %102 = vst.msk [vmem:[%s582_s3 + $0x8] sm:$0xff] %vm100_vm1, %v97_v30  ;;  %290 = vst.msk [vmem:[%s582_s3 + $0x10] sm:$0xff] %vm100_vm1, %v174_v33  ;;  %v177_v36 = vadd.f32 %v288_v0, %v176_v35  ;;  %v178_v37 = vpop.f32.mrb[3].mxu1 }
 0x101   :  { %291 = vst.msk [vmem:[%s582_s3 + $0x18] sm:$0xff] %vm100_vm1, %v177_v36 }
 0x11e   :  { %v253_v39 = vpop.f32.mrb[4].mxu0 }
 0x11f   :  { %v254_v40 = vadd.f32 %v311_v38, %v253_v39  ;;  %v255_v41 = vpop.f32.mrb[5].mxu0 }
 0x120   :  { %v256_v42 = vpop.f32.mrb[6].mxu0 }
 0x121   :  { %313 = vst.msk [vmem:[%s582_s3 + $0x20] sm:$0xff] %vm100_vm1, %v254_v40  ;;  %v257_v43 = vadd.f32 %v311_v38, %v256_v42  ;;  %v258_v44 = vpop.f32.mrb[7].mxu0 }
 0x123   :  { %314 = vst.msk [vmem:[%s582_s3 + $0x28] sm:$0xff] %vm100_vm1, %v257_v43 }

// kernel: model_forward.5
= control target key start
LH: loop header
LB: loop body
LE: loop exit
PB: predicated region body
PF: predicated region fallthrough
CT: control target
= control target key end

     0   :  { %13 = vsyncpa [#allocation8], 0  ;;  %vm71_vm0 = vcmask 916480   ;;  %vm149_vm1 = vcmask 261120   ;;  %s2130_s0 = inlined_call_operand.vmem [shape: f32[64,112], index: 0, kind: input, shape index: {}]   ;;  %s2131_s1 = inlined_call_operand.vmem [shape: s32[64,1], index: 1, kind: input, shape index: {}]   ;;  %s2132_s2 = inlined_call_operand.vmem [shape: f32[64,1], index: 2, kind: input, shape index: {}]   ;;  %s2133_s3 = inlined_call_operand.vmem [shape: f32[4,112,32], index: 3, kind: input, shape index: {}]   ;;  %s2134_s4 = inlined_call_operand.vmem [shape: f32[4,32,32], index: 4, kind: input, shape index: {}]   ;;  %s2135_s5 = inlined_call_operand.vmem [shape: f32[4,1,32], index: 5, kind: input, shape index: {}]   ;;  %s2136_s6 = inlined_call_operand.vmem [shape: f32[32,128], index: 6, kind: input, shape index: {}]   ;;  %s2137_s7 = inlined_call_operand.vmem [shape: f32[1,128], index: 7, kind: input, shape index: {}]   ;;  %s2138_s8 = inlined_call_operand.hbm [shape: f32[1], index: 8, kind: output, shape index: {}]  }
   0x1   :  { %v43_v0 = vld [vmem:[%s2133_s3] sm:$0xff]  ;;  %v44_v1 = vld [vmem:[%s2133_s3 + $0x8] sm:$0xff]  ;;  %v1067_v3 = vld [vmem:[%s2133_s3 + $0x70] sm:$0xff] }
   0x2   :  { %v57_v2 = vpack.c.bf16 %v44_v1, %v43_v0  ;;  %v1068_v4 = vld [vmem:[%s2133_s3 + $0x78] sm:$0xff]  ;;  %v45_v5 = vld [vmem:[%s2133_s3 + $0x10] sm:$0xff]  ;;  %v1069_v8 = vld [vmem:[%s2133_s3 + $0x80] sm:$0xff] }
   0x3   :  { %v173_v6 = vpack.c.bf16 %v1068_v4, %v1067_v3  ;;  %v46_v7 = vld [vmem:[%s2133_s3 + $0x18] sm:$0xff]  ;;  %v1070_v9 = vld [vmem:[%s2133_s3 + $0x88] sm:$0xff]  ;;  %v47_v12 = vld [vmem:[%s2133_s3 + $0x20] sm:$0xff] }
   0x4   :  { %1222 = vmatprep.subr.bf16.mxu0 %v57_v2  ;;  %v58_v10 = vpack.c.bf16 %v46_v7, %v45_v5  ;;  %v174_v11 = vpack.c.bf16 %v1070_v9, %v1069_v8  ;;  %v48_v13 = vld [vmem:[%s2133_s3 + $0x28] sm:$0xff]  ;;  %v1071_v14 = vld [vmem:[%s2133_s3 + $0x90] sm:$0xff]  ;;  %v1072_v15 = vld [vmem:[%s2133_s3 + $0x98] sm:$0xff] }
   0x5   :  { %1244 = vmatprep.subr.bf16.mxu1 %v173_v6  ;;  %1223 = vmatpush3.bf16.msra.mxu0 %v57_v2  ;;  %v59_v16 = vpack.c.bf16 %v48_v13, %v47_v12  ;;  %v175_v17 = vpack.c.bf16 %v1072_v15, %v1071_v14  ;;  %v49_v18 = vld [vmem:[%s2133_s3 + $0x30] sm:$0xff]  ;;  %v50_v19 = vld [vmem:[%s2133_s3 + $0x38] sm:$0xff]  ;;  %v1073_v20 = vld [vmem:[%s2133_s3 + $0xa0] sm:$0xff] }
   0x6   :  { %1245 = vmatpush3.bf16.msra.mxu1 %v173_v6  ;;  %1224 = vmatprep.subr.bf16.mxu0 %v58_v10  ;;  %v1074_v21 = vld [vmem:[%s2133_s3 + $0xa8] sm:$0xff]  ;;  %v60_v22 = vpack.c.bf16 %v50_v19, %v49_v18  ;;  %v31_v23 = vld [vmem:[%s2130_s0] sm:$0xff]  ;;  %v1075_v28 = vld [vmem:[%s2133_s3 + $0xb0] sm:$0xff] }
   0x7   :  { %1246 = vmatprep.subr.bf16.mxu1 %v174_v11  ;;  %v176_v24 = vpack.c.bf16 %v1074_v21, %v1073_v20  ;;  %v51_v25 = vld [vmem:[%s2133_s3 + $0x40] sm:$0xff]  ;;  %v52_v26 = vld [vmem:[%s2133_s3 + $0x48] sm:$0xff]  ;;  %v1076_v29 = vld [vmem:[%s2133_s3 + $0xb8] sm:$0xff] }
   0x8   :  { %v32_v27 = vld [vmem:[%s2130_s0 + $0x8] sm:$0xff]  ;;  %v61_v31 = vpack.c.bf16 %v52_v26, %v51_v25  ;;  %v177_v32 = vpack.c.bf16 %v1076_v29, %v1075_v28  ;;  %v53_v33 = vld [vmem:[%s2133_s3 + $0x50] sm:$0xff]  ;;  %v54_v34 = vld [vmem:[%s2133_s3 + $0x58] sm:$0xff] }
   0x9   :  { %1225 = vmatpush3.bf16.msra.mxu0 %v58_v10  ;;  %v1591_v30 = vpack.c.bf16 %v32_v27, %v31_v23  ;;  %v1077_v35 = vld [vmem:[%s2133_s3 + $0xc0] sm:$0xff]  ;;  %v1078_v36 = vld [vmem:[%s2133_s3 + $0xc8] sm:$0xff]  ;;  %v62_v37 = vpack.c.bf16 %v54_v34, %v53_v33  ;;  %v1079_v41 = vld [vmem:[%s2133_s3 + $0xd0] sm:$0xff] }
   0xa   :  { %1247 = vmatpush3.bf16.msra.mxu1 %v174_v11  ;;  %1226 = vmatprep.subr.bf16.mxu0 %v59_v16  ;;  %v178_v38 = vpack.c.bf16 %v1078_v36, %v1077_v35  ;;  %v55_v39 = vld [vmem:[%s2133_s3 + $0x60] sm:$0xff]  ;;  %v56_v40 = vld [vmem:[%s2133_s3 + $0x68] sm:$0xff]  ;;  %v1080_v42 = vld [vmem:[%s2133_s3 + $0xd8] sm:$0xff] }
   0xb   :  { %1248 = vmatprep.subr.bf16.mxu1 %v175_v17  ;;  %1236 = vmatprep.mubr.msk.bf16.mxu0 %vm71_vm0, %v1591_v30  ;;  %v63_v43 = vpack.c.bf16 %v56_v40, %v55_v39  ;;  %v179_v44 = vpack.c.bf16 %v1080_v42, %v1079_v41  ;;  %v1087_v45 = vld [vmem:[%s2133_s3 + $0xe0] sm:$0xff]  ;;  %v1088_v46 = vld [vmem:[%s2133_s3 + $0xe8] sm:$0xff]  ;;  %v1107_v47 = vld [vmem:[%s2133_s3 + $0x150] sm:$0xff] }
   0xc   :  { %1258 = vmatprep.mubr.msk.bf16.mxu1 %vm71_vm0, %v1591_v30  ;;  %v1108_v48 = vld [vmem:[%s2133_s3 + $0x158] sm:$0xff]  ;;  %v33_v49 = vld [vmem:[%s2130_s0 + $0x10] sm:$0xff]  ;;  %v276_v51 = vpack.c.bf16 %v1088_v46, %v1087_v45  ;;  %v1109_v55 = vld [vmem:[%s2133_s3 + $0x160] sm:$0xff] }
   0xd   :  { %1227 = vmatpush3.bf16.msra.mxu0 %v59_v16  ;;  %v34_v50 = vld [vmem:[%s2130_s0 + $0x18] sm:$0xff]  ;;  %v379_v52 = vpack.c.bf16 %v1108_v48, %v1107_v47  ;;  %v1089_v53 = vld [vmem:[%s2133_s3 + $0xf0] sm:$0xff]  ;;  %v1110_v57 = vld [vmem:[%s2133_s3 + $0x168] sm:$0xff] }
   0xe   :  { %1249 = vmatpush3.bf16.msra.mxu1 %v175_v17  ;;  %1228 = vmatprep.subr.bf16.mxu0 %v60_v22  ;;  %v1090_v54 = vld [vmem:[%s2133_s3 + $0xf8] sm:$0xff]  ;;  %v1648_v56 = vpack.c.bf16 %v34_v50, %v33_v49  ;;  %v35_v58 = vld [vmem:[%s2130_s0 + $0x20] sm:$0xff]  ;;  %v36_v59 = vld [vmem:[%s2130_s0 + $0x28] sm:$0xff]  ;;  %v380_v61 = vpack.c.bf16 %v1110_v57, %v1109_v55 }
   0xf   :  { %1250 = vmatprep.subr.bf16.mxu1 %v176_v24  ;;  %v277_v60 = vpack.c.bf16 %v1090_v54, %v1089_v53  ;;  %v1091_v62 = vld [vmem:[%s2133_s3 + $0x100] sm:$0xff]  ;;  %v1092_v63 = vld [vmem:[%s2133_s3 + $0x108] sm:$0xff]  ;;  %v1665_v0 = vpack.c.bf16 %v36_v59, %v35_v58  ;;  %v1111_v1 = vld [vmem:[%s2133_s3 + $0x170] sm:$0xff] }
  0x10   :  { %v1112_v2 = vld [vmem:[%s2133_s3 + $0x178] sm:$0xff]  ;;  %v37_v3 = vld [vmem:[%s2130_s0 + $0x30] sm:$0xff]  ;;  %v278_v5 = vpack.c.bf16 %v1092_v63, %v1091_v62  ;;  %v1113_v9 = vld [vmem:[%s2133_s3 + $0x180] sm:$0xff] }
  0x11   :  { %1229 = vmatpush3.bf16.msra.mxu0 %v60_v22  ;;  %v38_v4 = vld [vmem:[%s2130_s0 + $0x38] sm:$0xff]  ;;  %v381_v6 = vpack.c.bf16 %v1112_v2, %v1111_v1  ;;  %v1093_v7 = vld [vmem:[%s2133_s3 + $0x110] sm:$0xff]  ;;  %v1114_v10 = vld [vmem:[%s2133_s3 + $0x188] sm:$0xff] }
  0x12   :  { %1251 = vmatpush3.bf16.msra.mxu1 %v176_v24  ;;  %1230 = vmatprep.subr.bf16.mxu0 %v61_v31  ;;  %v1094_v8 = vld [vmem:[%s2133_s3 + $0x118] sm:$0xff]  ;;  %v42_v11 = vpack.c.bf16 %v38_v4, %v37_v3  ;;  %v382_v13 = vpack.c.bf16 %v1114_v10, %v1113_v9  ;;  %v1095_v14 = vld [vmem:[%s2133_s3 + $0x120] sm:$0xff]  ;;  %v1096_v15 = vld [vmem:[%s2133_s3 + $0x128] sm:$0xff] }
  0x13   :  { %1252 = vmatprep.subr.bf16.mxu1 %v177_v32  ;;  %v279_v12 = vpack.c.bf16 %v1094_v8, %v1093_v7  ;;  %v1115_v16 = vld [vmem:[%s2133_s3 + $0x190] sm:$0xff]  ;;  %v1116_v17 = vld [vmem:[%s2133_s3 + $0x198] sm:$0xff]  ;;  %v280_v18 = vpack.c.bf16 %v1096_v15, %v1095_v14  ;;  %v1117_v22 = vld [vmem:[%s2133_s3 + $0x1a0] sm:$0xff] }
  0x14   :  { %v383_v19 = vpack.c.bf16 %v1116_v17, %v1115_v16  ;;  %v1097_v20 = vld [vmem:[%s2133_s3 + $0x130] sm:$0xff]  ;;  %v1098_v21 = vld [vmem:[%s2133_s3 + $0x138] sm:$0xff]  ;;  %v1118_v23 = vld [vmem:[%s2133_s3 + $0x1a8] sm:$0xff] }
  0x15   :  { %1231 = vmatpush3.bf16.msra.mxu0 %v61_v31  ;;  %v281_v24 = vpack.c.bf16 %v1098_v21, %v1097_v20  ;;  %v384_v25 = vpack.c.bf16 %v1118_v23, %v1117_v22  ;;  %v1099_v26 = vld [vmem:[%s2133_s3 + $0x140] sm:$0xff]  ;;  %v1100_v27 = vld [vmem:[%s2133_s3 + $0x148] sm:$0xff]  ;;  %v1119_v28 = vld [vmem:[%s2133_s3 + $0x1b0] sm:$0xff] }
  0x16   :  { %1253 = vmatpush3.bf16.msra.mxu1 %v177_v32  ;;  %1232 = vmatprep.subr.bf16.mxu0 %v62_v37  ;;  %v1120_v29 = vld [vmem:[%s2133_s3 + $0x1b8] sm:$0xff]  ;;  %v1754_v32 = vld [vmem:[%s2134_s4] sm:$0xff]  ;;  %v1759_v33 = vld [vmem:[%s2134_s4 + $0x8] sm:$0xff] }
  0x17   :  { %1254 = vmatprep.subr.bf16.mxu1 %v178_v38  ;;  %v385_v31 = vpack.c.bf16 %v1120_v29, %v1119_v28  ;;  %v1764_v34 = vld [vmem:[%s2134_s4 + $0x10] sm:$0xff]  ;;  %v1769_v35 = vld [vmem:[%s2134_s4 + $0x18] sm:$0xff]  ;;  %v471_v36 = vpack.c.bf16 %v1759_v33, %v1754_v32  ;;  %v1807_v45 = vld [vmem:[%s2134_s4 + $0x48] sm:$0xff] }
  0x18   :  { %v472_v39 = vpack.c.bf16 %v1769_v35, %v1764_v34  ;;  %v1788_v40 = vld [vmem:[%s2134_s4 + $0x30] sm:$0xff]  ;;  %v1793_v41 = vld [vmem:[%s2134_s4 + $0x38] sm:$0xff]  ;;  %v1826_v50 = vld [vmem:[%s2134_s4 + $0x60] sm:$0xff] }
  0x19   :  { %1233 = vmatpush3.bf16.msra.mxu0 %v62_v37  ;;  %v1776_v37 = vld [vmem:[%s2134_s4 + $0x20] sm:$0xff]  ;;  %v1812_v46 = vld [vmem:[%s2134_s4 + $0x50] sm:$0xff]  ;;  %v1817_v47 = vld [vmem:[%s2134_s4 + $0x58] sm:$0xff] }
  0x1a   :  { %1255 = vmatpush3.bf16.msra.mxu1 %v178_v38  ;;  %1234 = vmatprep.subr.bf16.mxu0 %v63_v43  ;;  %v1781_v38 = vld [vmem:[%s2134_s4 + $0x28] sm:$0xff]  ;;  %v486_v49 = vpack.c.bf16 %v1817_v47, %v1812_v46  ;;  %v1841_v53 = vld [vmem:[%s2134_s4 + $0x78] sm:$0xff]  ;;  %v1082_v57 = vld [vmem:[%s2135_s5 + $0x1] ss:$0 sm:$0xff] }
  0x1b   :  { %1256 = vmatprep.subr.bf16.mxu1 %v179_v44  ;;  %v478_v42 = vpack.c.bf16 %v1781_v38, %v1776_v37 }
  0x1d   :  { %1235 = vmatpush3.bf16.msra.mxu0 %v63_v43  ;;  %v1800_v43 = vld [vmem:[%s2134_s4 + $0x40] sm:$0xff] }
  0x1e   :  { %1257 = vmatpush3.bf16.msra.mxu1 %v179_v44  ;;  %1266 = vmatprep.subr.bf16.mxu0 %v276_v51  ;;  %v479_v44 = vpack.c.bf16 %v1793_v41, %v1788_v40  ;;  %v485_v48 = vpack.c.bf16 %v1807_v45, %v1800_v43 }
  0x1f   :  { %1288 = vmatprep.subr.bf16.mxu1 %v379_v52 }
  0x20   :  { %1237 = vmatmul.mubr.msk.bf16.vlgmr.msra.gmra.mrb[0].mxu0 %vm71_vm0, %v1648_v56 }
  0x21   :  { %1259 = vmatmul.mubr.msk.bf16.vlgmr.msra.gmra.mrb[0].mxu1 %vm71_vm0, %v1648_v56  ;;  %1267 = vmatpush3.bf16.msra.mxu0 %v276_v51  ;;  %v1831_v51 = vld [vmem:[%s2134_s4 + $0x68] sm:$0xff] }
  0x22   :  { %1289 = vmatpush3.bf16.msra.mxu1 %v379_v52  ;;  %1268 = vmatprep.subr.bf16.mxu0 %v277_v60  ;;  %v1836_v52 = vld [vmem:[%s2134_s4 + $0x70] sm:$0xff]  ;;  %v492_v54 = vpack.c.bf16 %v1831_v51, %v1826_v50 }
  0x23   :  { %1290 = vmatprep.subr.bf16.mxu1 %v380_v61  ;;  %1240 = vmatprep.mubr.msk.bf16.mxu0 %vm71_vm0, %v1665_v0  ;;  %v493_v55 = vpack.c.bf16 %v1841_v53, %v1836_v52 }
  0x24   :  { %1262 = vmatprep.mubr.msk.bf16.mxu1 %vm71_vm0, %v1665_v0 }
  0x25   :  { %1269 = vmatpush3.bf16.msra.mxu0 %v277_v60 }
  0x26   :  { %1291 = vmatpush3.bf16.msra.mxu1 %v380_v61  ;;  %1270 = vmatprep.subr.bf16.mxu0 %v278_v5 }
  0x27   :  { %1292 = vmatprep.subr.bf16.mxu1 %v381_v6 }
  0x28   :  { %1241 = vmatmul.mubr.msk.bf16.gmra.mrb[4].mxu0 %vm71_vm0, %v42_v11 }
  0x29   :  { %1271 = vmatpush3.bf16.msra.mxu0 %v278_v5  ;;  %1263 = vmatmul.mubr.msk.bf16.gmra.mrb[4].mxu1 %vm71_vm0, %v42_v11 }
  0x2a   :  { %1293 = vmatpush3.bf16.msra.mxu1 %v381_v6  ;;  %1272 = vmatprep.subr.bf16.mxu0 %v279_v12 }
  0x2b   :  { %1294 = vmatprep.subr.bf16.mxu1 %v382_v13  ;;  %1280 = vmatprep.mubr.msk.bf16.mxu0 %vm71_vm0, %v1591_v30 }
  0x2c   :  { %1302 = vmatprep.mubr.msk.bf16.mxu1 %vm71_vm0, %v1591_v30  ;;  %v282_v30 = vpack.c.bf16 %v1100_v27, %v1099_v26  ;;  %v1102_v26 = vld [vmem:[%s2135_s5 + $0x2] ss:$0 sm:$0xff]  ;;  %v1122_v27 = vld [vmem:[%s2135_s5 + $0x3] ss:$0 sm:$0xff] }
  0x2d   :  { %1273 = vmatpush3.bf16.msra.mxu0 %v279_v12 }
  0x2e   :  { %1295 = vmatpush3.bf16.msra.mxu1 %v382_v13  ;;  %1274 = vmatprep.subr.bf16.mxu0 %v280_v18 }
  0x2f   :  { %1296 = vmatprep.subr.bf16.mxu1 %v383_v19 }
  0x31   :  { %1275 = vmatpush3.bf16.msra.mxu0 %v280_v18 }
  0x32   :  { %1297 = vmatpush3.bf16.msra.mxu1 %v383_v19  ;;  %1276 = vmatprep.subr.bf16.mxu0 %v281_v24 }
  0x33   :  { %1298 = vmatprep.subr.bf16.mxu1 %v384_v25 }
  0x35   :  { %1277 = vmatpush3.bf16.msra.mxu0 %v281_v24 }
  0x36   :  { %1299 = vmatpush3.bf16.msra.mxu1 %v384_v25  ;;  %1278 = vmatprep.subr.bf16.mxu0 %v282_v30 }
  0x37   :  { %1300 = vmatprep.subr.bf16.mxu1 %v385_v31 }
  0x39   :  { %1279 = vmatpush3.bf16.msra.mxu0 %v282_v30 }
  0x3a   :  { %1301 = vmatpush3.bf16.msra.mxu1 %v385_v31 }
  0x3c   :  { %1281 = vmatmul.mubr.msk.bf16.vlgmr.msra.gmra.mrb[8].mxu0 %vm71_vm0, %v1648_v56 }
  0x3d   :  { %1303 = vmatmul.mubr.msk.bf16.vlgmr.msra.gmra.mrb[8].mxu1 %vm71_vm0, %v1648_v56  ;;  %1284 = vmatprep.mubr.msk.bf16.mxu0 %vm71_vm0, %v1665_v0  ;;  %v1062_v56 = vld [vmem:[%s2135_s5] ss:$0 sm:$0xff]  ;;  %s1895_s5 = smov 0  }
  0x3e   :  { %1306 = vmatprep.mubr.msk.bf16.mxu1 %vm71_vm0, %v1665_v0 }
  0x44   :  { %1285 = vmatmul.mubr.msk.bf16.gmra.mrb[12].mxu0 %vm71_vm0, %v42_v11 }
  0x45   :  { %1307 = vmatmul.mubr.msk.bf16.gmra.mrb[12].mxu1 %vm71_vm0, %v42_v11 }
  0xf3   :  { %v1238_v58 = vpop.f32.mrb[0].mxu0 }
  0xf4   :  { %v127_v59 = vadd.f32 %v1238_v58, %v1062_v56  ;;  %v1260_v60 = vpop.f32.mrb[0].mxu1  ;;  %v118_v61 = vpop.f32.mrb[1].mxu0 }
  0xf5   :  { %v231_v62 = vadd.f32 %v1260_v60, %v1082_v57  ;;  %v119_v63 = vadd.f32 %v1062_v56, %v118_v61  ;;  %v222_v0 = vpop.f32.mrb[1].mxu1  ;;  %v1239_v1 = vpop.f32.mrb[2].mxu0 }
  0xf6   :  { %152 = vst.msk [vmem:[#allocation2 + $0x10] sm:$0xff] %vm149_vm1, %v127_v59  ;;  %v223_v2 = vadd.f32 %v1082_v57, %v222_v0  ;;  %v130_v3 = vadd.f32 %v1239_v1, %v1062_v56  ;;  %v1261_v4 = vpop.f32.mrb[2].mxu1  ;;  %v121_v5 = vpop.f32.mrb[3].mxu0 }
  0xf7   :  { %255 = vst.msk [vmem:[#allocation3 + $0x10] sm:$0xff] %vm149_vm1, %v231_v62  ;;  %150 = vst.msk [vmem:[#allocation2] sm:$0xff] %vm149_vm1, %v119_v63  ;;  %v234_v6 = vadd.f32 %v1261_v4, %v1082_v57  ;;  %v122_v7 = vadd.f32 %v1062_v56, %v121_v5  ;;  %v225_v8 = vpop.f32.mrb[3].mxu1 }
  0xf8   :  { %253 = vst.msk [vmem:[#allocation3] sm:$0xff] %vm149_vm1, %v223_v2  ;;  %153 = vst.msk [vmem:[#allocation2 + $0x18] sm:$0xff] %vm149_vm1, %v130_v3  ;;  %v226_v9 = vadd.f32 %v1082_v57, %v225_v8 }
  0xf9   :  { %256 = vst.msk [vmem:[#allocation3 + $0x18] sm:$0xff] %vm149_vm1, %v234_v6  ;;  %151 = vst.msk [vmem:[#allocation2 + $0x8] sm:$0xff] %vm149_vm1, %v122_v7 }
  0xfa   :  { %254 = vst.msk [vmem:[#allocation3 + $0x8] sm:$0xff] %vm149_vm1, %v226_v9 }
  0xfb   :  { %v1242_v10 = vpop.f32.mrb[4].mxu0 }
  0xfc   :  { %v143_v11 = vadd.f32 %v1242_v10, %v1062_v56  ;;  %v1264_v12 = vpop.f32.mrb[4].mxu1  ;;  %v134_v13 = vpop.f32.mrb[5].mxu0 }
  0xfd   :  { %v247_v14 = vadd.f32 %v1264_v12, %v1082_v57  ;;  %v135_v15 = vadd.f32 %v1062_v56, %v134_v13  ;;  %v238_v16 = vpop.f32.mrb[5].mxu1  ;;  %v1243_v17 = vpop.f32.mrb[6].mxu0 }
  0xfe   :  { %156 = vst.msk [vmem:[#allocation2 + $0x30] sm:$0xff] %vm149_vm1, %v143_v11  ;;  %v239_v18 = vadd.f32 %v1082_v57, %v238_v16  ;;  %v146_v19 = vadd.f32 %v1243_v17, %v1062_v56  ;;  %v1265_v20 = vpop.f32.mrb[6].mxu1  ;;  %v137_v21 = vpop.f32.mrb[7].mxu0 }
  0xff   :  { %259 = vst.msk [vmem:[#allocation3 + $0x30] sm:$0xff] %vm149_vm1, %v247_v14  ;;  %154 = vst.msk [vmem:[#allocation2 + $0x20] sm:$0xff] %vm149_vm1, %v135_v15  ;;  %v250_v22 = vadd.f32 %v1265_v20, %v1082_v57  ;;  %v138_v23 = vadd.f32 %v1062_v56, %v137_v21  ;;  %v241_v24 = vpop.f32.mrb[7].mxu1  ;;  %v1891_v20 = vmov 0.0   ;;  %v1893_v21 = vmov 0.0  }
 0x100   :  { %257 = vst.msk [vmem:[#allocation3 + $0x20] sm:$0xff] %vm149_vm1, %v239_v18  ;;  %157 = vst.msk [vmem:[#allocation2 + $0x38] sm:$0xff] %vm149_vm1, %v146_v19  ;;  %v242_v25 = vadd.f32 %v1082_v57, %v241_v24 }
 0x101   :  { %260 = vst.msk [vmem:[#allocation3 + $0x38] sm:$0xff] %vm149_vm1, %v250_v22  ;;  %155 = vst.msk [vmem:[#allocation2 + $0x28] sm:$0xff] %vm149_vm1, %v138_v23 }
 0x102   :  { %258 = vst.msk [vmem:[#allocation3 + $0x28] sm:$0xff] %vm149_vm1, %v242_v25 }
 0x10f   :  { %v1282_v28 = vpop.f32.mrb[8].mxu0 }
 0x110   :  { %v334_v29 = vadd.f32 %v1282_v28, %v1102_v26  ;;  %v1304_v30 = vpop.f32.mrb[8].mxu1  ;;  %v325_v31 = vpop.f32.mrb[9].mxu0 }
 0x111   :  { %v437_v56 = vadd.f32 %v1304_v30, %v1122_v27  ;;  %v326_v57 = vadd.f32 %v1102_v26, %v325_v31  ;;  %v428_v58 = vpop.f32.mrb[9].mxu1  ;;  %v1283_v59 = vpop.f32.mrb[10].mxu0 }
 0x112   :  { %358 = vst.msk [vmem:[#allocation4 + $0x10] sm:$0xff] %vm149_vm1, %v334_v29  ;;  %v429_v60 = vadd.f32 %v1122_v27, %v428_v58  ;;  %v337_v61 = vadd.f32 %v1283_v59, %v1102_v26  ;;  %v1305_v62 = vpop.f32.mrb[10].mxu1  ;;  %v328_v63 = vpop.f32.mrb[11].mxu0 }
 0x113   :  { %461 = vst.msk [vmem:[#allocation5 + $0x10] sm:$0xff] %vm149_vm1, %v437_v56  ;;  %356 = vst.msk [vmem:[#allocation4] sm:$0xff] %vm149_vm1, %v326_v57  ;;  %v440_v0 = vadd.f32 %v1305_v62, %v1122_v27  ;;  %v329_v1 = vadd.f32 %v1102_v26, %v328_v63  ;;  %v431_v2 = vpop.f32.mrb[11].mxu1 }
 0x114   :  { %459 = vst.msk [vmem:[#allocation5] sm:$0xff] %vm149_vm1, %v429_v60  ;;  %359 = vst.msk [vmem:[#allocation4 + $0x18] sm:$0xff] %vm149_vm1, %v337_v61  ;;  %v432_v3 = vadd.f32 %v1122_v27, %v431_v2 }
 0x115   :  { %462 = vst.msk [vmem:[#allocation5 + $0x18] sm:$0xff] %vm149_vm1, %v440_v0  ;;  %357 = vst.msk [vmem:[#allocation4 + $0x8] sm:$0xff] %vm149_vm1, %v329_v1 }
 0x116   :  { %460 = vst.msk [vmem:[#allocation5 + $0x8] sm:$0xff] %vm149_vm1, %v432_v3 }
 0x117   :  { %v1286_v4 = vpop.f32.mrb[12].mxu0 }
 0x118   :  { %v350_v5 = vadd.f32 %v1286_v4, %v1102_v26  ;;  %v1308_v6 = vpop.f32.mrb[12].mxu1  ;;  %v341_v7 = vpop.f32.mrb[13].mxu0 }
 0x119   :  { %v453_v8 = vadd.f32 %v1308_v6, %v1122_v27  ;;  %v342_v9 = vadd.f32 %v1102_v26, %v341_v7  ;;  %v444_v10 = vpop.f32.mrb[13].mxu1  ;;  %v1287_v11 = vpop.f32.mrb[14].mxu0 }
 0x11a   :  { %362 = vst.msk [vmem:[#allocation4 + $0x30] sm:$0xff] %vm149_vm1, %v350_v5  ;;  %v445_v12 = vadd.f32 %v1122_v27, %v444_v10  ;;  %v353_v13 = vadd.f32 %v1287_v11, %v1102_v26  ;;  %v1309_v14 = vpop.f32.mrb[14].mxu1  ;;  %v344_v15 = vpop.f32.mrb[15].mxu0 }
 0x11b   :  { %465 = vst.msk [vmem:[#allocation5 + $0x30] sm:$0xff] %vm149_vm1, %v453_v8  ;;  %360 = vst.msk [vmem:[#allocation4 + $0x20] sm:$0xff] %vm149_vm1, %v342_v9  ;;  %v456_v16 = vadd.f32 %v1309_v14, %v1122_v27  ;;  %v345_v17 = vadd.f32 %v1102_v26, %v344_v15  ;;  %v447_v18 = vpop.f32.mrb[15].mxu1 }
 0x11c   :  { %463 = vst.msk [vmem:[#allocation5 + $0x20] sm:$0xff] %vm149_vm1, %v445_v12  ;;  %363 = vst.msk [vmem:[#allocation4 + $0x38] sm:$0xff] %vm149_vm1, %v353_v13  ;;  %v448_v19 = vadd.f32 %v1122_v27, %v447_v18 }
 0x11d   :  { %466 = vst.msk [vmem:[#allocation5 + $0x38] sm:$0xff] %vm149_vm1, %v456_v16  ;;  %361 = vst.msk [vmem:[#allocation4 + $0x28] sm:$0xff] %vm149_vm1, %v345_v17 }
 0x11e   :  { %464 = vst.msk [vmem:[#allocation5 + $0x28] sm:$0xff] %vm149_vm1, %v448_v19 }
 0x11f LB: > { %v1475_v22 = vmov 0.0   ;;  %vm1476_vm2 = vmmov 0   ;;  %v502_v23 = vpack.c.bf16 %v1469_v21, %v1469_v21  ;;  %s1933_s13 = sshll.u32 %s1473_s5, 3  ;;  %s499_s5 = sadd.s32 1, %s1473_s5   ;;  %s1473_s5 = sphi %s1895_s5, %s499_s5   ;;  %v1469_v21 = vphi %v1893_v21, %v702_v21   ;;  %v1465_v20 = vphi %v1891_v20, %v700_v20  }
 0x120   : > { %1310 = vmatprep.subr.bf16.mxu0 %v1475_v22  ;;  %1318 = vmatprep.subr.bf16.mxu1 %v1475_v22  ;;  %s504_s14 = scalar_lea.vmem [#allocation2], %s1933_s13  ;;  %s556_s15 = scalar_lea.vmem [#allocation3], %s1933_s13 }
 0x121   : > { %1311 = vmatpush3.bf16.msra.mxu0 %v471_v36  ;;  %1319 = vmatpush3.bf16.msra.mxu1 %v478_v42  ;;  %v505_v24 = vld [vmem:[%s504_s14] sm:$0xff]  ;;  %s649_s16 = scalar_lea.vmem [#allocation5], %s1933_s13  ;;  %s605_s17 = scalar_lea.vmem [#allocation4], %s1933_s13 }
 0x122   : > { %1312 = vmatprep.subr.bf16.mxu0 %v1475_v22  ;;  %1320 = vmatprep.subr.bf16.mxu1 %v1475_v22  ;;  %v557_v25 = vld [vmem:[%s556_s15] sm:$0xff]  ;;  %s703_s18 = scalar_lea.vmem [#allocation6], %s1933_s13  ;;  %p496_p0 = scmp.ge.s32.totalorder %s499_s5, 8  }
 0x123   : > { %1314 = vmatprep.mubr.msk.bf16.mxu0 %vm1476_vm2, %v1475_v22  ;;  %1322 = vmatprep.mubr.msk.bf16.mxu1 %vm1476_vm2, %v1475_v22  ;;  %v1477_v42 = vmov (%p496_p0), 0   ;;  %v1147_v43 = vld [vmem:[%s2137_s7] ss:$0 sm:$0xff] (%p496_p0)  ;;  %vm1001_vm11 = vcmask (%p496_p0), 7168   ;;  %s1439_s30 = scalar_lea.hbm (%p496_p0), %s2138_s8, 16 }
 0x124   : > { %v606_v1 = vld [vmem:[%s605_s17] sm:$0xff]  ;;  %1406 = vset.pattern.permute.xlu1 (%p496_p0), %v1477_v42  ;;  %1405 = vset.pattern.permute.xlu0 (%p496_p0), %v1477_v42  ;;  %p1440_p1 = scmp.ne.s32.totalorder (%p496_p0), %s2138_s8, %s1439_s30  ;;  %p1443_p2 = scmp.lt.u32.totalorder (%p496_p0), %s1439_s30, %s2138_s8 }
 0x125   : > { %1313 = vmatpush3.bf16.msra.mxu0 %v472_v39  ;;  %1321 = vmatpush3.bf16.msra.mxu1 %v479_v44  ;;  %v650_v62 = vld [vmem:[%s649_s16] sm:$0xff] }
 0x126   : > { %1326 = vmatprep.subr.bf16.mxu0 %v1475_v22  ;;  %1334 = vmatprep.subr.bf16.mxu1 %v1475_v22  ;;  %p1445_p3 = pnand (%p496_p0), %p1443_p2, %p1440_p1 }
 0x128   : > { %1315 = vmatmul.mubr.msk.bf16.vlgmr.msra.gmra.mrb[0].mxu0 %vm149_vm1, %v502_v23  ;;  %1323 = vmatmul.mubr.msk.bf16.vlgmr.msra.gmra.mrb[0].mxu1 %vm149_vm1, %v502_v23 }
 0x129   : > { %1327 = vmatpush3.bf16.msra.mxu0 %v485_v48  ;;  %1335 = vmatpush3.bf16.msra.mxu1 %v492_v54 }
 0x12a   : > { %1328 = vmatprep.subr.bf16.mxu0 %v1475_v22  ;;  %1336 = vmatprep.subr.bf16.mxu1 %v1475_v22 }
 0x12b   : > { %1330 = vmatprep.mubr.msk.bf16.mxu0 %vm1476_vm2, %v1475_v22  ;;  %1338 = vmatprep.mubr.msk.bf16.mxu1 %vm1476_vm2, %v1475_v22 }
 0x12d   : > { %1329 = vmatpush3.bf16.msra.mxu0 %v486_v49  ;;  %1337 = vmatpush3.bf16.msra.mxu1 %v493_v55 }
 0x130   : > { %1331 = vmatmul.mubr.msk.bf16.vlgmr.msra.gmra.mrb[4].mxu0 %vm149_vm1, %v502_v23  ;;  %1339 = vmatmul.mubr.msk.bf16.vlgmr.msra.gmra.mrb[4].mxu1 %vm149_vm1, %v502_v23 }
 0x1fb   : > { %v543_v26 = vpop.f32.mrb[0].mxu0  ;;  %v592_v27 = vpop.f32.mrb[0].mxu1 }
 0x1fc   : > { %v549_v28 = vadd.f32 %v543_v26, %v505_v24  ;;  %v598_v29 = vadd.f32 %v592_v27, %v557_v25  ;;  %v1316_v30 = vpop.f32.mrb[1].mxu0  ;;  %v1324_v31 = vpop.f32.mrb[1].mxu1  ;;  %v717_v25 = vld [vmem:[%s2136_s6] sm:$0xff] (%p496_p0)  ;;  %v718_v26 = vld [vmem:[%s2136_s6 + $0x8] sm:$0xff] (%p496_p0)  ;;  %v719_v27 = vld [vmem:[%s2136_s6 + $0x10] sm:$0xff] (%p496_p0) }
 0x1fd   : > { %v546_v56 = vpop.f32.mrb[2].mxu0  ;;  %v595_v57 = vpop.f32.mrb[2].mxu1 }
 0x1fe   : > { %v1141_v58 = vmul.f32 -1.442695, %v549_v28  ;;  %v1143_v59 = vmul.f32 -1.442695, %v598_v29  ;;  %v1317_v60 = vpop.f32.mrb[3].mxu0  ;;  %v1325_v61 = vpop.f32.mrb[3].mxu1  ;;  %v721_v28 = vpack.c.bf16 (%p496_p0), %v718_v26, %v717_v25 }
 0x1ff   :  { %v720_v29 = vld [vmem:[%s2136_s6 + $0x18] sm:$0xff] (%p496_p0)  ;;  %v898_v60 = vld [vmem:[%s2131_s1 + $0x8] sm:$0xff] (%p496_p0)  ;;  %v899_v61 = vld [vmem:[%s2131_s1 + $0x10] sm:$0xff] (%p496_p0) }
 0x200   : > { %1389 = vpow2.f32 %v1141_v58  ;;  %v722_v56 = vpack.c.bf16 (%p496_p0), %v720_v29, %v719_v27  ;;  %1342 = vmatprep.subr.bf16.mxu0 (%p496_p0), %v721_v28  ;;  %1354 = vmatprep.subr.bf16.mxu1 (%p496_p0), %v721_v28 }
 0x201   : > { %1391 = vpow2.f32 %v1143_v59  ;;  %1343 = vmatpush3.bf16.msra.mxu0 (%p496_p0), %v721_v28  ;;  %1356 = vmatpush3.bf16.msra.mxu1 (%p496_p0), %v721_v28 }
 0x202   :  { %1344 = vmatprep.subr.bf16.mxu0 (%p496_p0), %v722_v56  ;;  %1355 = vmatprep.subr.bf16.mxu1 (%p496_p0), %v722_v56 }
 0x203   : > { %v641_v63 = vpop.f32.mrb[4].mxu0  ;;  %v685_v0 = vpop.f32.mrb[4].mxu1 }
 0x204   : > { %v691_v2 = vadd.f32 %v685_v0, %v650_v62  ;;  %v1332_v3 = vpop.f32.mrb[5].mxu0  ;;  %v1340_v4 = vpop.f32.mrb[5].mxu1  ;;  %v647_v10 = vadd.f32 %v641_v63, %v606_v1  ;;  %v900_v62 = vld [vmem:[%s2131_s1 + $0x18] sm:$0xff] (%p496_p0)  ;;  %v901_v63 = vld [vmem:[%s2131_s1 + $0x20] sm:$0xff] (%p496_p0)  ;;  %v902_v0 = vld [vmem:[%s2131_s1 + $0x28] sm:$0xff] (%p496_p0) }
 0x205   : > { %v644_v5 = vpop.f32.mrb[6].mxu0  ;;  %v688_v6 = vpop.f32.mrb[6].mxu1  ;;  %1345 = vmatpush3.bf16.msra.mxu0 (%p496_p0), %v722_v56  ;;  %1357 = vmatpush3.bf16.msra.mxu1 (%p496_p0), %v722_v56  ;;  %v903_v1 = vld [vmem:[%s2131_s1 + $0x30] sm:$0xff] (%p496_p0) }
 0x206   : > { %v1146_v7 = vmul.f32 -1.442695, %v691_v2  ;;  %v1333_v8 = vpop.f32.mrb[7].mxu0  ;;  %v1341_v9 = vpop.f32.mrb[7].mxu1 }
 0x208   : > { %1393 = vpow2.f32 %v1146_v7 }
 0x209   : > { %1395 = vtanh.f32 %v647_v10 }
 0x20a   : > { %v1390_v11 = vpop.eup %1389 }
 0x20b   : > { %v1392_v12 = vpop.eup %1391  ;;  %v553_v13 = vadd.f32 1.0, %v1390_v11 }
 0x20c   : > { %v602_v14 = vadd.f32 1.0, %v1392_v12 }
 0x20d   : > { %1397 = vrcp.f32 %v553_v13 }
 0x20e   : > { %1399 = vrcp.f32 %v602_v14 }
 0x212   : > { %v1394_v15 = vpop.eup %1393 }
 0x213   : > { %v1396_v16 = vpop.eup %1395  ;;  %v695_v18 = vadd.f32 1.0, %v1394_v15 }
 0x215   : > { %1401 = vrcp.f32 %v695_v18 }
 0x217   : > { %v1398_v17 = vpop.eup %1397 }
 0x218   : > { %v1400_v19 = vpop.eup %1399  ;;  %v699_v21 = vmul.f32 %v1398_v17, %v1396_v16 }
 0x219   : > { %v698_v22 = vmul.f32 %v1465_v20, %v1400_v19 }
 0x21b   : > { %v700_v20 = vadd.f32 %v699_v21, %v698_v22  }
 0x21d   : > { %1403 = vtanh.f32 %v700_v20 }
 0x21f   : > { %v1402_v23 = vpop.eup %1401 }
 0x224   :  { %498 = sbr.rel (!%p496_p0) target bundleno = 287 (0x11f), region = 74 }
 0x227   : > { %v1404_v24 = vpop.eup %1403 }
 0x228   : > { %v702_v21 = vmul.f32 %v1404_v24, %v1402_v23  }
 0x22a   : > { %704 = vst.msk [vmem:[%s703_s18] sm:$0xff] %vm149_vm1, %v702_v21 }
 0x231   :  { %v705_v30 = vld [vmem:[#allocation6] sm:$0xff]  ;;  %v706_v31 = vld [vmem:[#allocation6 + $0x8] sm:$0xff]  ;;  %v707_v34 = vld [vmem:[#allocation6 + $0x10] sm:$0xff] }
 0x232   :  { %v713_v32 = vpack.c.bf16 %v706_v31, %v705_v30  ;;  %v709_v33 = vld [vmem:[#allocation6 + $0x20] sm:$0xff]  ;;  %v710_v35 = vld [vmem:[#allocation6 + $0x28] sm:$0xff]  ;;  %v708_v36 = vld [vmem:[#allocation6 + $0x18] sm:$0xff] }
 0x233   :  { %v715_v37 = vpack.c.bf16 %v710_v35, %v709_v33  ;;  %v711_v38 = vld [vmem:[#allocation6 + $0x30] sm:$0xff]  ;;  %v712_v39 = vld [vmem:[#allocation6 + $0x38] sm:$0xff]  ;;  %v714_v40 = vpack.c.bf16 %v708_v36, %v707_v34  ;;  %v897_v35 = vld [vmem:[%s2131_s1] sm:$0xff] }
 0x234   :  { %1346 = vmatprep.mubr.msk.bf16.mxu0 %vm149_vm1, %v713_v32  ;;  %v716_v41 = vpack.c.bf16 %v712_v39, %v711_v38  ;;  %v904_v34 = vld [vmem:[%s2131_s1 + $0x38] sm:$0xff] }
 0x235   :  { %1350 = vmatprep.mubr.msk.bf16.mxu1 %vm149_vm1, %v715_v37  ;;  %1347 = vmatmul.mubr.msk.bf16.vlgmr.msra.gmra.mrb[0].mxu0 %vm149_vm1, %v714_v40 }
 0x236   :  { %1351 = vmatmul.mubr.msk.bf16.vlgmr.msra.gmra.mrb[0].mxu1 %vm149_vm1, %v716_v41 }
 0x308   :  { %v1348_v44 = vpop.f32.mrb[0].mxu0 }
 0x309   :  { %v1352_v45 = vpop.f32.mrb[0].mxu1  ;;  %v1968_v46 = vadd.f32 %v1348_v44, %v1147_v43  ;;  %v776_v47 = vpop.f32.mrb[1].mxu0 }
 0x30a   :  { %v792_v48 = vpop.f32.mrb[1].mxu1  ;;  %v1970_v49 = vadd.f32 %v1147_v43, %v776_v47  ;;  %v1349_v50 = vpop.f32.mrb[2].mxu0  ;;  %v1988_v59 = vadd.f32 %v1352_v45, %v1147_v43 }
 0x30b   :  { %v1353_v51 = vpop.f32.mrb[2].mxu1  ;;  %811 = vmax.xlane.f32.xlu1 %v1968_v46  ;;  %v779_v52 = vpop.f32.mrb[3].mxu0  ;;  %v1974_v54 = vadd.f32 %v1349_v50, %v1147_v43  ;;  %v1981_v57 = vadd.f32 %v1147_v43, %v792_v48 }
 0x30c   :  { %v795_v53 = vpop.f32.mrb[3].mxu1  ;;  %807 = vmax.xlane.f32.xlu0 %v1970_v49  ;;  %v1976_v55 = vadd.f32 %v1147_v43, %v779_v52  ;;  %v1978_v20 = vadd.f32 %v1353_v51, %v1147_v43  ;;  %v895_v51 = vlaneseq }
 0x30d   :  { %v1986_v58 = vadd.f32 %v1147_v43, %v795_v53 }
 0x30f   :  { %813 = vmax.xlane.f32.xlu1 %v1974_v54 }
 0x310   :  { %809 = vmax.xlane.f32.xlu0 %v1976_v55 }
 0x313   :  { %821 = vmax.xlane.f32.xlu1 %v1978_v20 }
 0x314   :  { %815 = vmax.xlane.f32.xlu0 %v1981_v57 }
 0x317   :  { %817 = vmax.xlane.f32.xlu1 %v1986_v58 }
 0x318   :  { %819 = vmax.xlane.f32.xlu0 %v1988_v59 }
 0x328   :  { %909 = vperm.xlu1 %1406, %v898_v60  }
 0x32c   :  { %912 = vperm.xlu1 %1406, %v899_v61   ;;  %v2056_v61 = vand.u32 127, %v895_v51 }
 0x330   :  { %915 = vperm.xlu1 %1406, %v900_v62  }
 0x334   :  { %918 = vperm.xlu1 %1406, %v901_v63  }
 0x338   :  { %921 = vperm.xlu1 %1406, %v902_v0  }
 0x33c   :  { %924 = vperm.xlu1 %1406, %v903_v1  }
 0x398   :  { %v2010_v2 = vpop.xlane.xlu1 %811 }
 0x399   :  { %v825_v3 = vsub.f32 %v1968_v46, %v2010_v2  ;;  %v2014_v4 = vpop.xlane.xlu0 %807 }
 0x39a   :  { %v823_v19 = vsub.f32 %v1970_v49, %v2014_v4 }
 0x39b   :  { %v835_v5 = vmul.f32 1.442695, %v825_v3 }
 0x39c   :  { %v2016_v6 = vpop.xlane.xlu1 %813  ;;  %v831_v25 = vmul.f32 1.442695, %v823_v19 }
 0x39d   :  { %1407 = vpow2.f32 %v835_v5  ;;  %v826_v7 = vsub.f32 %v1974_v54, %v2016_v6  ;;  %v2020_v8 = vpop.xlane.xlu0 %809 }
 0x39e   :  { %v824_v11 = vsub.f32 %v1976_v55, %v2020_v8 }
 0x39f   :  { %v837_v9 = vmul.f32 1.442695, %v826_v7 }
 0x3a0   :  { %v2022_v10 = vpop.xlane.xlu1 %821  ;;  %v833_v16 = vmul.f32 1.442695, %v824_v11 }
 0x3a1   :  { %1409 = vpow2.f32 %v837_v9  ;;  %v830_v12 = vsub.f32 %v1978_v20, %v2022_v10  ;;  %v2028_v13 = vpop.xlane.xlu0 %815 }
 0x3a2   :  { %v827_v26 = vsub.f32 %v1981_v57, %v2028_v13 }
 0x3a3   :  { %v845_v14 = vmul.f32 1.442695, %v830_v12 }
 0x3a4   :  { %v2030_v15 = vpop.xlane.xlu1 %817  ;;  %v839_v28 = vmul.f32 1.442695, %v827_v26 }
 0x3a5   :  { %1411 = vpow2.f32 %v845_v14  ;;  %v828_v17 = vsub.f32 %v1986_v58, %v2030_v15  ;;  %v2034_v18 = vpop.xlane.xlu0 %819  ;;  %v1478_v14 = vmov 0.0  }
 0x3a6   :  { %v829_v21 = vsub.f32 %v1988_v59, %v2034_v18  ;;  %1413 = vpow2.f32 %v833_v16 }
 0x3a7   :  { %v1408_v22 = vpop.eup %1407  ;;  %v841_v24 = vmul.f32 1.442695, %v828_v17 }
 0x3a8   :  { %v843_v23 = vmul.f32 1.442695, %v829_v21  ;;  %851 = vadd.xlane.f32.xlu0 %v1408_v22  ;;  %v910_v36 = vpop.permute.xlu1 %909 }
 0x3a9   :  { %vm930_vm3 = vcmp.eq.s32.totalorder %v2056_v61, %v910_v36 }
 0x3aa   :  { %1415 = vpow2.f32 %v843_v23  ;;  %v1153_v16 = vsel %vm930_vm3, 1.0, %v1478_v14 }
 0x3ab   :  { %v1410_v27 = vpop.eup %1409  ;;  %1417 = vpow2.f32 %v841_v24 }
 0x3ac   :  { %853 = vadd.xlane.f32.xlu1 %v1410_v27  ;;  %1419 = vpow2.f32 %v831_v25  ;;  %v913_v37 = vpop.permute.xlu1 %912 }
 0x3ad   :  { %1421 = vpow2.f32 %v839_v28  ;;  %vm931_vm4 = vcmp.eq.s32.totalorder %v2056_v61, %v913_v37 }
 0x3ae   :  { %v1154_v27 = vsel %vm931_vm4, 1.0, %v1478_v14 }
 0x3af   :  { %v1412_v29 = vpop.eup %1411 }
 0x3b0   :  { %861 = vadd.xlane.f32.xlu1 %v1412_v29  ;;  %v1414_v30 = vpop.eup %1413  ;;  %v2048_v38 = vpop.permute.xlu1 %915 }
 0x3b1   :  { %vm932_vm6 = vcmp.eq.s32.totalorder %v2056_v61, %v2048_v38 }
 0x3b4   :  { %v1416_v31 = vpop.eup %1415  ;;  %849 = vadd.xlane.f32.xlu1 %v1414_v30  ;;  %v2050_v39 = vpop.permute.xlu1 %918 }
 0x3b5   :  { %859 = vadd.xlane.f32.xlu0 %v1416_v31  ;;  %v1418_v56 = vpop.eup %1417  ;;  %vm933_vm7 = vcmp.eq.s32.totalorder %v2056_v61, %v2050_v39 }
 0x3b6   :  { %v1420_v32 = vpop.eup %1419 }
 0x3b7   :  { %v1422_v33 = vpop.eup %1421 }
 0x3b8   :  { %857 = vadd.xlane.f32.xlu1 %v1418_v56  ;;  %v2052_v40 = vpop.permute.xlu1 %921 }
 0x3b9   :  { %847 = vadd.xlane.f32.xlu0 %v1420_v32  ;;  %vm934_vm8 = vcmp.eq.s32.totalorder %v2056_v61, %v2052_v40 }
 0x3ba   :  { %v1157_v37 = vsel %vm934_vm8, 1.0, %v1478_v14 }
 0x3bc   :  { %v2054_v41 = vpop.permute.xlu1 %924 }
 0x3bd   :  { %855 = vadd.xlane.f32.xlu0 %v1422_v33  ;;  %v1155_v33 = vsel %vm932_vm6, 1.0, %v1478_v14  ;;  %vm935_vm9 = vcmp.eq.s32.totalorder %v2056_v61, %v2054_v41 }
 0x3c9   :  { %927 = vperm.xlu1 %1406, %v904_v34  }
 0x3d3   :  { %906 = vperm.xlu0 %1405, %v897_v35  }
 0x435   :  { %v852_v43 = vpop.xlane.xlu0 %851 }
 0x436   :  { %1423 = vlog2.f32 %v852_v43 }
 0x439   :  { %v854_v42 = vpop.xlane.xlu1 %853 }
 0x43a   :  { %1425 = vlog2.f32 %v854_v42 }
 0x43d   :  { %v862_v44 = vpop.xlane.xlu1 %861 }
 0x440   :  { %v1424_v52 = vpop.eup %1423 }
 0x441   :  { %v850_v45 = vpop.xlane.xlu1 %849  ;;  %v868_v62 = vmul.f32 0.6931472, %v1424_v52 }
 0x442   :  { %1427 = vlog2.f32 %v850_v45  ;;  %v860_v47 = vpop.xlane.xlu0 %859 }
 0x443   :  { %1429 = vlog2.f32 %v860_v47  ;;  %v881_v3 = vadd.f32 %v868_v62, %v2010_v2 }
 0x444   :  { %v1426_v60 = vpop.eup %1425 }
 0x445   :  { %v858_v48 = vpop.xlane.xlu1 %857  ;;  %v870_v5 = vmul.f32 0.6931472, %v1426_v60  ;;  %v889_v2 = vsub.f32 %v1968_v46, %v881_v3 }
 0x446   :  { %1431 = vlog2.f32 %v858_v48  ;;  %v848_v50 = vpop.xlane.xlu0 %847 }
 0x447   :  { %1433 = vlog2.f32 %v848_v50  ;;  %v882_v21 = vadd.f32 %v870_v5, %v2016_v6  ;;  %v955_v46 = vmul.f32 %v1154_v27, %v889_v2 }
 0x448   :  { %1435 = vlog2.f32 %v862_v44  ;;  %v987_v44 = vld [vmem:[%s2132_s2 + $0x10] sm:$0xff] }
 0x449   :  { %v890_v30 = vsub.f32 %v1974_v54, %v882_v21  ;;  %v928_v36 = vpop.permute.xlu1 %927 }
 0x44a   :  { %v856_v53 = vpop.xlane.xlu0 %855  ;;  %vm936_vm10 = vcmp.eq.s32.totalorder %v2056_v61, %v928_v36 }
 0x44b   :  { %1437 = vlog2.f32 %v856_v53  ;;  %v956_v35 = vmul.f32 %v1155_v33, %v890_v30  ;;  %v988_v53 = vld [vmem:[%s2132_s2 + $0x18] sm:$0xff] }
 0x44c   :  { %v1428_v63 = vpop.eup %1427 }
 0x44d   :  { %v866_v0 = vmul.f32 0.6931472, %v1428_v63  ;;  %v1430_v1 = vpop.eup %1429 }
 0x44e   :  { %v876_v24 = vmul.f32 0.6931472, %v1430_v1 }
 0x44f   :  { %v880_v7 = vadd.f32 %v866_v0, %v2020_v8 }
 0x450   :  { %v1432_v9 = vpop.eup %1431  ;;  %v885_v31 = vadd.f32 %v876_v24, %v2034_v18 }
 0x451   :  { %v1434_v11 = vpop.eup %1433  ;;  %v888_v12 = vsub.f32 %v1976_v55, %v880_v7  ;;  %v874_v8 = vmul.f32 0.6931472, %v1432_v9 }
 0x452   :  { %v864_v17 = vmul.f32 0.6931472, %v1434_v11  ;;  %v907_v19 = vpop.permute.xlu0 %906  ;;  %v1436_v23 = vpop.eup %1435 }
 0x453   :  { %v954_v22 = vmul.f32 %v1153_v16, %v888_v12  ;;  %vm929_vm5 = vcmp.eq.s32.totalorder %v2056_v61, %v907_v19  ;;  %v878_v29 = vmul.f32 0.6931472, %v1436_v23  ;;  %v989_v61 = vld [vmem:[%s2132_s2 + $0x20] sm:$0xff] }
 0x454   :  { %v879_v25 = vadd.f32 %v864_v17, %v2014_v4  ;;  %v1152_v55 = vsel %vm929_vm5, 1.0, %v1478_v14  ;;  %v884_v4 = vadd.f32 %v874_v8, %v2030_v15  ;;  %v893_v15 = vsub.f32 %v1988_v59, %v885_v31  ;;  %v991_v17 = vld [vmem:[%s2132_s2 + $0x30] sm:$0xff] }
 0x455   :  { %v1438_v26 = vpop.eup %1437  ;;  %963 = vadd.xlane.f32.xlu0 %v954_v22  ;;  %v886_v54 = vadd.f32 %v878_v29, %v2022_v10  ;;  %v1159_v10 = vsel %vm936_vm10, 1.0, %v1478_v14 }
 0x456   :  { %v872_v28 = vmul.f32 0.6931472, %v1438_v26  ;;  %v887_v6 = vsub.f32 %v1970_v49, %v879_v25  ;;  %v1156_v49 = vsel %vm933_vm7, 1.0, %v1478_v14 }
 0x457   :  { %v894_v40 = vsub.f32 %v1978_v20, %v886_v54  ;;  %v985_v20 = vld [vmem:[%s2132_s2] sm:$0xff] }
 0x458   :  { %v883_v56 = vadd.f32 %v872_v28, %v2028_v13  ;;  %v953_v32 = vmul.f32 %v1152_v55, %v887_v6  ;;  %v892_v13 = vsub.f32 %v1986_v58, %v884_v4  ;;  %v986_v58 = vld [vmem:[%s2132_s2 + $0x8] sm:$0xff]  ;;  %v992_v55 = vld [vmem:[%s2132_s2 + $0x38] sm:$0xff] }
 0x459   :  { %965 = vadd.xlane.f32.xlu0 %v955_v46  ;;  %v960_v41 = vmul.f32 %v1159_v10, %v894_v40 }
 0x45a   :  { %961 = vadd.xlane.f32.xlu1 %v953_v32  ;;  %v891_v34 = vsub.f32 %v1981_v57, %v883_v56  ;;  %v1158_v57 = vsel %vm935_vm9, 1.0, %v1478_v14  ;;  %v958_v39 = vmul.f32 %v1157_v37, %v892_v13  ;;  %v990_v14 = vld [vmem:[%s2132_s2 + $0x28] sm:$0xff] }
 0x45b   :  { %v959_v38 = vmul.f32 %v1158_v57, %v893_v15 }
 0x45c   :  { %v957_v18 = vmul.f32 %v1156_v49, %v891_v34 }
 0x45e   :  { %969 = vadd.xlane.f32.xlu0 %v957_v18  ;;  %967 = vadd.xlane.f32.xlu1 %v956_v35 }
 0x462   :  { %973 = vadd.xlane.f32.xlu0 %v959_v38  ;;  %971 = vadd.xlane.f32.xlu1 %v958_v39 }
 0x466   :  { %975 = vadd.xlane.f32.xlu1 %v960_v41 }
 0x4e2   :  { %v964_v42 = vpop.xlane.xlu0 %963 }
 0x4e3   :  { %v978_v59 = vsub.f32 0.0, %v964_v42 }
 0x4e5   :  { %v994_v48 = vmul.f32 %v986_v58, %v978_v59 }
 0x4e6   :  { %v966_v43 = vpop.xlane.xlu0 %965 }
 0x4e7   :  { %v979_v45 = vsub.f32 0.0, %v966_v43  ;;  %v962_v47 = vpop.xlane.xlu1 %961  ;;  %v1003_v63 = vsel %vm1001_vm11, %v994_v48, 0.0 }
 0x4e8   :  { %v977_v50 = vsub.f32 0.0, %v962_v47 }
 0x4e9   :  { %v995_v51 = vmul.f32 %v987_v44, %v979_v45 }
 0x4ea   :  { %v993_v52 = vmul.f32 %v985_v20, %v977_v50 }
 0x4eb   :  { %v968_v60 = vpop.xlane.xlu1 %967  ;;  %v970_v62 = vpop.xlane.xlu0 %969  ;;  %v1005_v7 = vsel %vm1001_vm11, %v995_v51, 0.0 }
 0x4ec   :  { %v1002_v0 = vsel %vm1001_vm11, %v993_v52, 0.0  ;;  %v980_v1 = vsub.f32 0.0, %v968_v60  ;;  %v981_v3 = vsub.f32 0.0, %v970_v62 }
 0x4ed   :  { %v1004_v5 = vadd.f32 %v1003_v63, %v1002_v0 }
 0x4ee   :  { %v996_v9 = vmul.f32 %v988_v53, %v980_v1  ;;  %v997_v11 = vmul.f32 %v989_v61, %v981_v3 }
 0x4ef   :  { %v1006_v12 = vadd.f32 %v1005_v7, %v1004_v5  ;;  %v972_v16 = vpop.xlane.xlu1 %971  ;;  %v974_v19 = vpop.xlane.xlu0 %973 }
 0x4f0   :  { %v1007_v21 = vsel %vm1001_vm11, %v996_v9, 0.0  ;;  %v982_v22 = vsub.f32 0.0, %v972_v16  ;;  %v983_v2 = vsub.f32 0.0, %v974_v19  ;;  %v1009_v24 = vsel %vm1001_vm11, %v997_v11, 0.0 }
 0x4f1   :  { %v1008_v23 = vadd.f32 %v1007_v21, %v1006_v12 }
 0x4f2   :  { %v998_v8 = vmul.f32 %v990_v14, %v982_v22  ;;  %v999_v25 = vmul.f32 %v991_v17, %v983_v2 }
 0x4f3   :  { %v1010_v26 = vadd.f32 %v1009_v24, %v1008_v23  ;;  %v976_v27 = vpop.xlane.xlu1 %975 }
 0x4f4   :  { %v1011_v28 = vsel %vm1001_vm11, %v998_v8, 0.0  ;;  %v984_v6 = vsub.f32 0.0, %v976_v27  ;;  %v1013_v30 = vsel %vm1001_vm11, %v999_v25, 0.0 }
 0x4f5   :  { %v1012_v29 = vadd.f32 %v1011_v28, %v1010_v26 }
 0x4f6   :  { %v1000_v46 = vmul.f32 %v992_v55, %v984_v6 }
 0x4f7   :  { %v1014_v31 = vadd.f32 %v1013_v30, %v1012_v29 }
 0x4f8   :  { %v1015_v4 = vsel %vm1001_vm11, %v1000_v46, 0.0 }
 0x4f9   :  { %v1016_v56 = vadd.f32 %v1015_v4, %v1014_v31 }
 0x4fb   :  { %1017 = vadd.xlane.f32.xlu0 %v1016_v56 }
 0x588   :  { %v1018_v32 = vpop.xlane.xlu0 %1017 }
 0x589   :  { %v1019_v33 = vrot.slane %v1018_v32, 4 }
 0x58b   :  { %v1020_v34 = vadd.f32 %v1019_v33, %v1018_v32 }
 0x58d   :  { %v1021_v49 = vrot.slane %v1020_v34, 2 }
 0x58f   :  { %v1022_v54 = vadd.f32 %v1021_v49, %v1020_v34 }
 0x591   :  { %v1023_v18 = vrot.slane %v1022_v54, 1 }
 0x593   :  { %v1024_v35 = vadd.f32 %v1023_v18, %v1022_v54 }
 0x595   :  { %1358 = vpush %v1024_v35 }
 0x5c6   :  { %s1359_s2 = spop %1358 }
 0x5c7   :  { %1027 = sst [smem:[#allocation7]] %s1359_s2 }
 0x5c8   :  { %1448 = shalt.err (!%p1445_p3)
}
 0x5c9   :  { %s1479_s12 = smov [#allocation7]  }
 0x5ca   :  { %1035 = dma.smem_to_hbm %s1479_s12, 16, %s2138_s8, [#allocation8]  }
 0x5cb   :  { %1461 = dma.done.wait [#allocation8], 16  }
 0x5cc   :  { %1462 = vsyncadd [#allocation8], 4294967280 }
 0x5cd   :  { %1039 = sfence }
 0x5ce   :  { %1040 = vsyncpa [#allocation8], 1 }

</bundles_post_ra>
